<compile_context>
chip_gen: v6e
topology: v6e:2x2x1
jax: 0.10.0
libtpu: 0.0.40
codegen_flags: <defaults>
</compile_context>

<pallas_src>
import functools

import jax
import jax.numpy as jnp
from jax.experimental import pallas as pl
from jax.experimental.pallas import tpu as pltpu  # noqa: F401  (TPU backend)


def bert_encoder_kernel(tok_ref, seg_ref, pos_ref, mask_ref,
                        wqkv_ref, bqkv_ref, wo_ref, bo_ref,
                        g1_ref, be1_ref, w1_ref, b1_ref, w2_ref, b2_ref,
                        g2_ref, be2_ref,
                        o_ref, *, num_heads, num_layers):
    # Embedding sum fused into the kernel (the gathers themselves stay in JAX glue).
    x = tok_ref[...] + seg_ref[...] + pos_ref[...]          # (B*S, H)
    BS, H = x.shape
    dh = H // num_heads
    scale = jnp.float32(1.0 / (dh ** 0.5))
    neg = jnp.float32(-1e6)
    mask = mask_ref[...] > 0.0                              # (B*S, B*S) valid-key mask

    def layer_norm(z, g, beta):                             # torch.nn.LayerNorm semantics
        mu = jnp.mean(z, axis=-1, keepdims=True)
        var = jnp.mean((z - mu) ** 2, axis=-1, keepdims=True)
        return (z - mu) * jax.lax.rsqrt(var + 1e-5) * g + beta

    for l in range(num_layers):                             # static unroll, weights stay in VMEM
        # ---- multi-head self attention (fused QKV matmul) ----
        qkv = jnp.dot(x, wqkv_ref[l], preferred_element_type=jnp.float32) + bqkv_ref[l]
        wo = wo_ref[l]                                      # (H, H)

        attn = jnp.zeros((BS, H), dtype=jnp.float32)
        for h in range(num_heads):                          # static unroll (num_heads small)
            qh = qkv[:, h * dh:(h + 1) * dh]
            kh = qkv[:, H + h * dh:H + (h + 1) * dh]
            vh = qkv[:, 2 * H + h * dh:2 * H + (h + 1) * dh]
            # scores = qh @ kh.T  (contraction on dh, no explicit transpose)
            scores = jax.lax.dot_general(qh, kh, (((1,), (1,)), ((), ())),
                                         preferred_element_type=jnp.float32) * scale
            scores = jnp.where(mask, scores, neg)           # d2l masked_softmax (-1e6 fill)
            m = jnp.max(scores, axis=-1, keepdims=True)
            p = jnp.exp(scores - m)
            p = p * pl.reciprocal(jnp.sum(p, axis=-1, keepdims=True), approx=True)
            head = jnp.dot(p, vh, preferred_element_type=jnp.float32)     # (B*S, dh)
            # fused output projection: accumulate head @ W_o[h*dh:(h+1)*dh] -> no concat
            attn = attn + jnp.dot(head, wo[h * dh:(h + 1) * dh, :],
                                  preferred_element_type=jnp.float32)
        attn = attn + bo_ref[l]

        # ---- addnorm1 (dropout == identity at inference) ----
        y = layer_norm(x + attn, g1_ref[l], be1_ref[l])

        # ---- position-wise FFN ----
        hdn = jnp.maximum(
            jnp.dot(y, w1_ref[l], preferred_element_type=jnp.float32) + b1_ref[l], 0.0)
        ffn = jnp.dot(hdn, w2_ref[l], preferred_element_type=jnp.float32) + b2_ref[l]

        # ---- addnorm2 ----
        x = layer_norm(y + ffn, g2_ref[l], be2_ref[l])

    o_ref[...] = x


def pack_params(layers):
    """Stack per-layer params along a leading layer axis; fuse Wq|Wk|Wv -> Wqkv."""
    def stack(name):
        return jnp.stack([ly[name] for ly in layers], axis=0)
    wqkv = jnp.stack(
        [jnp.concatenate([ly['wq'], ly['wk'], ly['wv']], axis=1) for ly in layers], axis=0)
    bqkv = jnp.stack(
        [jnp.concatenate([ly['bq'], ly['bk'], ly['bv']], axis=1) for ly in layers], axis=0)
    return (wqkv, bqkv, stack('wo'), stack('bo'),
            stack('g1'), stack('be1'),
            stack('w1'), stack('b1'), stack('w2'), stack('b2'),
            stack('g2'), stack('be2'))


def bert_encoder(tokens, segments, valid_lens, params, num_heads):
    B, S = tokens.shape
    H = params['tok_emb'].shape[1]
    num_layers = len(params['layers'])
    BS = B * S

    # TODO(synk): embedding gathers are data-dependent lookups; kept in plain JAX glue.
    tok = params['tok_emb'][tokens].reshape(BS, H).astype(jnp.float32)
    seg = params['seg_emb'][segments].reshape(BS, H).astype(jnp.float32)
    pos = jnp.broadcast_to(params['pos_emb'][:, :S, :], (B, S, H))
    pos = pos.reshape(BS, H).astype(jnp.float32)

    # Block-diagonal key mask over the flattened rows:
    # key j attendable from query i  iff  same batch row AND (j % S) < valid_len[i // S].
    rows = jnp.arange(BS, dtype=jnp.int32)
    row_batch = rows // S
    key_pos = rows % S
    same_batch = row_batch[:, None] == row_batch[None, :]
    within_valid = key_pos[None, :] < valid_lens.astype(jnp.int32)[row_batch][:, None]
    mask = (same_batch & within_valid).astype(jnp.float32)            # (BS, BS)

    packed = pack_params(params['layers'])

    # Grid-less call: whole batch + all stacked layer weights (< 100 KB) fit in VMEM,
    # so a single invocation removes per-batch-step and per-layer launch overhead.
    out_flat = pl.pallas_call(
        functools.partial(bert_encoder_kernel,
                          num_heads=num_heads, num_layers=num_layers),
        out_shape=jax.ShapeDtypeStruct((BS, H), jnp.float32),
    )(tok, seg, pos, mask, *packed)

    # TODO(synk): output last dim is H=32 (<128 lanes) so stores are masked; a lane-dense
    # (BS*H/128, 128) slab would require an in-kernel relayout costing more than the
    # ~2 KB writeback it would save at these shapes.
    return out_flat.reshape(B, S, H)


def init_params(key, vocab_size, num_hiddens, ffn_num_hiddens, num_layers, max_len):
    keys = jax.random.split(key, 4 + num_layers)
    tok_emb = 0.02 * jax.random.normal(keys[0], (vocab_size, num_hiddens), jnp.float32)
    seg_emb = 0.02 * jax.random.normal(keys[1], (2, num_hiddens), jnp.float32)
    pos_emb = jax.random.normal(keys[2], (1, max_len, num_hiddens), jnp.float32)

    layers = []
    for i in range(num_layers):
        lk = jax.random.split(keys[4 + i], 6)
        H, F = num_hiddens, ffn_num_hiddens
        layers.append(dict(
            wq=0.02 * jax.random.normal(lk[0], (H, H), jnp.float32),
            bq=jnp.zeros((1, H), jnp.float32),
            wk=0.02 * jax.random.normal(lk[1], (H, H), jnp.float32),
            bk=jnp.zeros((1, H), jnp.float32),
            wv=0.02 * jax.random.normal(lk[2], (H, H), jnp.float32),
            bv=jnp.zeros((1, H), jnp.float32),
            wo=0.02 * jax.random.normal(lk[3], (H, H), jnp.float32),
            bo=jnp.zeros((1, H), jnp.float32),
            g1=jnp.ones((1, H), jnp.float32),
            be1=jnp.zeros((1, H), jnp.float32),
            w1=0.02 * jax.random.normal(lk[4], (H, F), jnp.float32),
            b1=jnp.zeros((1, F), jnp.float32),
            w2=0.02 * jax.random.normal(lk[5], (F, H), jnp.float32),
            b2=jnp.zeros((1, H), jnp.float32),
            g2=jnp.ones((1, H), jnp.float32),
            be2=jnp.zeros((1, H), jnp.float32),
        ))
    return dict(tok_emb=tok_emb, seg_emb=seg_emb, pos_emb=pos_emb, layers=layers)


if __name__ == "__main__":
    # small, demo-consistent shapes
    vocab_size, num_hiddens, ffn_num_hiddens = 100, 32, 64
    num_heads, num_layers, max_len = 4, 2, 64
    batch, seq = 2, 8

    key = jax.random.PRNGKey(0)
    k_params, k_tok, k_seg = jax.random.split(key, 3)

    params = init_params(k_params, vocab_size, num_hiddens, ffn_num_hiddens,
                         num_layers, max_len)

    tokens = jax.random.randint(k_tok, (batch, seq), 0, vocab_size, dtype=jnp.int32)
    segments = jax.random.randint(k_seg, (batch, seq), 0, 2, dtype=jnp.int32)
    valid_lens = jnp.array([8, 5], dtype=jnp.int32)

    out = bert_encoder(tokens, segments, valid_lens, params, num_heads)
    out = jax.block_until_ready(out)
    assert out.shape == (batch, seq, num_hiddens), out.shape
    print("KERNEL_OK")
</pallas_src>

<mosaic_0001>
module attributes {stable_mosaic.version = 11 : i64} {
  func.func @bert_encoder_kernel(%arg0: memref<16x32xf32, #tpu.memory_space<vmem>>, %arg1: memref<16x32xf32, #tpu.memory_space<vmem>>, %arg2: memref<16x32xf32, #tpu.memory_space<vmem>>, %arg3: memref<16x16xf32, #tpu.memory_space<vmem>>, %arg4: memref<2x32x96xf32, #tpu.memory_space<vmem>>, %arg5: memref<2x1x96xf32, #tpu.memory_space<vmem>>, %arg6: memref<2x32x32xf32, #tpu.memory_space<vmem>>, %arg7: memref<2x1x32xf32, #tpu.memory_space<vmem>>, %arg8: memref<2x1x32xf32, #tpu.memory_space<vmem>>, %arg9: memref<2x1x32xf32, #tpu.memory_space<vmem>>, %arg10: memref<2x32x64xf32, #tpu.memory_space<vmem>>, %arg11: memref<2x1x64xf32, #tpu.memory_space<vmem>>, %arg12: memref<2x64x32xf32, #tpu.memory_space<vmem>>, %arg13: memref<2x1x32xf32, #tpu.memory_space<vmem>>, %arg14: memref<2x1x32xf32, #tpu.memory_space<vmem>>, %arg15: memref<2x1x32xf32, #tpu.memory_space<vmem>>, %arg16: memref<16x32xf32, #tpu.memory_space<vmem>>) attributes {dimension_semantics = [], scalar_prefetch = 0 : i64, scratch_operands = 0 : i64, tpu.core_type = #tpu.core_type<tc>} {
    %c0 = arith.constant 0 : index
    %c0_0 = arith.constant 0 : index
    %0 = vector.load %arg0[%c0, %c0_0] : memref<16x32xf32, #tpu.memory_space<vmem>>, vector<16x32xf32>
    %c0_1 = arith.constant 0 : index
    %c0_2 = arith.constant 0 : index
    %1 = vector.load %arg1[%c0_1, %c0_2] : memref<16x32xf32, #tpu.memory_space<vmem>>, vector<16x32xf32>
    %2 = arith.addf %0, %1 : vector<16x32xf32>
    %c0_3 = arith.constant 0 : index
    %c0_4 = arith.constant 0 : index
    %3 = vector.load %arg2[%c0_3, %c0_4] : memref<16x32xf32, #tpu.memory_space<vmem>>, vector<16x32xf32>
    %4 = arith.addf %2, %3 : vector<16x32xf32>
    %c0_5 = arith.constant 0 : index
    %c0_6 = arith.constant 0 : index
    %5 = vector.load %arg3[%c0_5, %c0_6] : memref<16x16xf32, #tpu.memory_space<vmem>>, vector<16x16xf32>
    %cst = arith.constant 0.000000e+00 : f32
    %6 = vector.broadcast %cst : f32 to vector<16x16xf32>
    %7 = arith.cmpf ogt, %5, %6 : vector<16x16xf32>
    %c0_7 = arith.constant 0 : index
    %c0_8 = arith.constant 0 : index
    %c0_9 = arith.constant 0 : index
    %8 = vector.load %arg4[%c0_7, %c0_8, %c0_9] : memref<2x32x96xf32, #tpu.memory_space<vmem>>, vector<1x32x96xf32>
    %9 = vector.shape_cast %8 : vector<1x32x96xf32> to vector<32x96xf32>
    %cst_10 = arith.constant dense<0.000000e+00> : vector<16x96xf32>
    %10 = tpu.matmul %4, %9, %cst_10 {dimension_numbers = #tpu.dot_dimension_numbers<[1], [0], [0], [1], [0, 0, 1, 1], [], []>} : vector<16x32xf32>, vector<32x96xf32>, vector<16x96xf32> -> vector<16x96xf32>
    %c0_11 = arith.constant 0 : index
    %c0_12 = arith.constant 0 : index
    %c0_13 = arith.constant 0 : index
    %11 = vector.load %arg5[%c0_11, %c0_12, %c0_13] : memref<2x1x96xf32, #tpu.memory_space<vmem>>, vector<1x1x96xf32>
    %12 = vector.shape_cast %11 : vector<1x1x96xf32> to vector<1x96xf32>
    %13 = vector.broadcast %12 : vector<1x96xf32> to vector<16x96xf32>
    %14 = arith.addf %10, %13 : vector<16x96xf32>
    %c0_14 = arith.constant 0 : index
    %c0_15 = arith.constant 0 : index
    %c0_16 = arith.constant 0 : index
    %15 = vector.load %arg6[%c0_14, %c0_15, %c0_16] : memref<2x32x32xf32, #tpu.memory_space<vmem>>, vector<1x32x32xf32>
    %16 = vector.shape_cast %15 : vector<1x32x32xf32> to vector<32x32xf32>
    %cst_17 = arith.constant 0.000000e+00 : f32
    %17 = vector.broadcast %cst_17 : f32 to vector<16x32xf32>
    %18 = vector.extract_strided_slice %14 {offsets = [0, 0], sizes = [16, 8], strides = [1, 1]} : vector<16x96xf32> to vector<16x8xf32>
    %19 = vector.extract_strided_slice %14 {offsets = [0, 32], sizes = [16, 8], strides = [1, 1]} : vector<16x96xf32> to vector<16x8xf32>
    %20 = vector.extract_strided_slice %14 {offsets = [0, 64], sizes = [16, 8], strides = [1, 1]} : vector<16x96xf32> to vector<16x8xf32>
    %cst_18 = arith.constant dense<0.000000e+00> : vector<16x16xf32>
    %21 = tpu.matmul %18, %19, %cst_18 {dimension_numbers = #tpu.dot_dimension_numbers<[1], [1], [0], [0], [0, 0, 1, 0], [], []>} : vector<16x8xf32>, vector<16x8xf32>, vector<16x16xf32> -> vector<16x16xf32>
    %cst_19 = arith.constant 0.353553385 : f32
    %22 = vector.broadcast %cst_19 : f32 to vector<16x16xf32>
    %23 = arith.mulf %21, %22 : vector<16x16xf32>
    %cst_20 = arith.constant -1.000000e+06 : f32
    %24 = vector.broadcast %cst_20 : f32 to vector<16x16xf32>
    %25 = arith.select %7, %23, %24 : vector<16x16xi1>, vector<16x16xf32>
    %cst_21 = arith.constant dense<0xFF800000> : vector<16xf32>
    %26 = vector.multi_reduction <maximumf>, %25, %cst_21 [1] : vector<16x16xf32> to vector<16xf32>
    %27 = vector.shape_cast %26 : vector<16xf32> to vector<16x1xf32>
    %28 = vector.broadcast %27 : vector<16x1xf32> to vector<16x16xf32>
    %29 = arith.subf %25, %28 : vector<16x16xf32>
    %30 = math.exp %29 : vector<16x16xf32>
    %cst_22 = arith.constant dense<0.000000e+00> : vector<16xf32>
    %31 = vector.multi_reduction <add>, %30, %cst_22 [1] : vector<16x16xf32> to vector<16xf32>
    %32 = vector.shape_cast %31 : vector<16xf32> to vector<16x1xf32>
    %33 = tpu.reciprocal %32 {approx = true} : vector<16x1xf32> -> vector<16x1xf32>
    %34 = vector.broadcast %33 : vector<16x1xf32> to vector<16x16xf32>
    %35 = arith.mulf %30, %34 : vector<16x16xf32>
    %cst_23 = arith.constant dense<0.000000e+00> : vector<16x8xf32>
    %36 = tpu.matmul %35, %20, %cst_23 {dimension_numbers = #tpu.dot_dimension_numbers<[1], [0], [0], [1], [0, 0, 1, 1], [], []>} : vector<16x16xf32>, vector<16x8xf32>, vector<16x8xf32> -> vector<16x8xf32>
    %37 = vector.extract_strided_slice %16 {offsets = [0, 0], sizes = [8, 32], strides = [1, 1]} : vector<32x32xf32> to vector<8x32xf32>
    %cst_24 = arith.constant dense<0.000000e+00> : vector<16x32xf32>
    %38 = tpu.matmul %36, %37, %cst_24 {dimension_numbers = #tpu.dot_dimension_numbers<[1], [0], [0], [1], [0, 0, 1, 1], [], []>} : vector<16x8xf32>, vector<8x32xf32>, vector<16x32xf32> -> vector<16x32xf32>
    %39 = arith.addf %17, %38 : vector<16x32xf32>
    %40 = vector.extract_strided_slice %14 {offsets = [0, 8], sizes = [16, 8], strides = [1, 1]} : vector<16x96xf32> to vector<16x8xf32>
    %41 = vector.extract_strided_slice %14 {offsets = [0, 40], sizes = [16, 8], strides = [1, 1]} : vector<16x96xf32> to vector<16x8xf32>
    %42 = vector.extract_strided_slice %14 {offsets = [0, 72], sizes = [16, 8], strides = [1, 1]} : vector<16x96xf32> to vector<16x8xf32>
    %cst_25 = arith.constant dense<0.000000e+00> : vector<16x16xf32>
    %43 = tpu.matmul %40, %41, %cst_25 {dimension_numbers = #tpu.dot_dimension_numbers<[1], [1], [0], [0], [0, 0, 1, 0], [], []>} : vector<16x8xf32>, vector<16x8xf32>, vector<16x16xf32> -> vector<16x16xf32>
    %cst_26 = arith.constant 0.353553385 : f32
    %44 = vector.broadcast %cst_26 : f32 to vector<16x16xf32>
    %45 = arith.mulf %43, %44 : vector<16x16xf32>
    %cst_27 = arith.constant -1.000000e+06 : f32
    %46 = vector.broadcast %cst_27 : f32 to vector<16x16xf32>
    %47 = arith.select %7, %45, %46 : vector<16x16xi1>, vector<16x16xf32>
    %cst_28 = arith.constant dense<0xFF800000> : vector<16xf32>
    %48 = vector.multi_reduction <maximumf>, %47, %cst_28 [1] : vector<16x16xf32> to vector<16xf32>
    %49 = vector.shape_cast %48 : vector<16xf32> to vector<16x1xf32>
    %50 = vector.broadcast %49 : vector<16x1xf32> to vector<16x16xf32>
    %51 = arith.subf %47, %50 : vector<16x16xf32>
    %52 = math.exp %51 : vector<16x16xf32>
    %cst_29 = arith.constant dense<0.000000e+00> : vector<16xf32>
    %53 = vector.multi_reduction <add>, %52, %cst_29 [1] : vector<16x16xf32> to vector<16xf32>
    %54 = vector.shape_cast %53 : vector<16xf32> to vector<16x1xf32>
    %55 = tpu.reciprocal %54 {approx = true} : vector<16x1xf32> -> vector<16x1xf32>
    %56 = vector.broadcast %55 : vector<16x1xf32> to vector<16x16xf32>
    %57 = arith.mulf %52, %56 : vector<16x16xf32>
    %cst_30 = arith.constant dense<0.000000e+00> : vector<16x8xf32>
    %58 = tpu.matmul %57, %42, %cst_30 {dimension_numbers = #tpu.dot_dimension_numbers<[1], [0], [0], [1], [0, 0, 1, 1], [], []>} : vector<16x16xf32>, vector<16x8xf32>, vector<16x8xf32> -> vector<16x8xf32>
    %59 = vector.extract_strided_slice %16 {offsets = [8, 0], sizes = [8, 32], strides = [1, 1]} : vector<32x32xf32> to vector<8x32xf32>
    %cst_31 = arith.constant dense<0.000000e+00> : vector<16x32xf32>
    %60 = tpu.matmul %58, %59, %cst_31 {dimension_numbers = #tpu.dot_dimension_numbers<[1], [0], [0], [1], [0, 0, 1, 1], [], []>} : vector<16x8xf32>, vector<8x32xf32>, vector<16x32xf32> -> vector<16x32xf32>
    %61 = arith.addf %39, %60 : vector<16x32xf32>
    %62 = vector.extract_strided_slice %14 {offsets = [0, 16], sizes = [16, 8], strides = [1, 1]} : vector<16x96xf32> to vector<16x8xf32>
    %63 = vector.extract_strided_slice %14 {offsets = [0, 48], sizes = [16, 8], strides = [1, 1]} : vector<16x96xf32> to vector<16x8xf32>
    %64 = vector.extract_strided_slice %14 {offsets = [0, 80], sizes = [16, 8], strides = [1, 1]} : vector<16x96xf32> to vector<16x8xf32>
    %cst_32 = arith.constant dense<0.000000e+00> : vector<16x16xf32>
    %65 = tpu.matmul %62, %63, %cst_32 {dimension_numbers = #tpu.dot_dimension_numbers<[1], [1], [0], [0], [0, 0, 1, 0], [], []>} : vector<16x8xf32>, vector<16x8xf32>, vector<16x16xf32> -> vector<16x16xf32>
    %cst_33 = arith.constant 0.353553385 : f32
    %66 = vector.broadcast %cst_33 : f32 to vector<16x16xf32>
    %67 = arith.mulf %65, %66 : vector<16x16xf32>
    %cst_34 = arith.constant -1.000000e+06 : f32
    %68 = vector.broadcast %cst_34 : f32 to vector<16x16xf32>
    %69 = arith.select %7, %67, %68 : vector<16x16xi1>, vector<16x16xf32>
    %cst_35 = arith.constant dense<0xFF800000> : vector<16xf32>
    %70 = vector.multi_reduction <maximumf>, %69, %cst_35 [1] : vector<16x16xf32> to vector<16xf32>
    %71 = vector.shape_cast %70 : vector<16xf32> to vector<16x1xf32>
    %72 = vector.broadcast %71 : vector<16x1xf32> to vector<16x16xf32>
    %73 = arith.subf %69, %72 : vector<16x16xf32>
    %74 = math.exp %73 : vector<16x16xf32>
    %cst_36 = arith.constant dense<0.000000e+00> : vector<16xf32>
    %75 = vector.multi_reduction <add>, %74, %cst_36 [1] : vector<16x16xf32> to vector<16xf32>
    %76 = vector.shape_cast %75 : vector<16xf32> to vector<16x1xf32>
    %77 = tpu.reciprocal %76 {approx = true} : vector<16x1xf32> -> vector<16x1xf32>
    %78 = vector.broadcast %77 : vector<16x1xf32> to vector<16x16xf32>
    %79 = arith.mulf %74, %78 : vector<16x16xf32>
    %cst_37 = arith.constant dense<0.000000e+00> : vector<16x8xf32>
    %80 = tpu.matmul %79, %64, %cst_37 {dimension_numbers = #tpu.dot_dimension_numbers<[1], [0], [0], [1], [0, 0, 1, 1], [], []>} : vector<16x16xf32>, vector<16x8xf32>, vector<16x8xf32> -> vector<16x8xf32>
    %81 = vector.extract_strided_slice %16 {offsets = [16, 0], sizes = [8, 32], strides = [1, 1]} : vector<32x32xf32> to vector<8x32xf32>
    %cst_38 = arith.constant dense<0.000000e+00> : vector<16x32xf32>
    %82 = tpu.matmul %80, %81, %cst_38 {dimension_numbers = #tpu.dot_dimension_numbers<[1], [0], [0], [1], [0, 0, 1, 1], [], []>} : vector<16x8xf32>, vector<8x32xf32>, vector<16x32xf32> -> vector<16x32xf32>
    %83 = arith.addf %61, %82 : vector<16x32xf32>
    %84 = vector.extract_strided_slice %14 {offsets = [0, 24], sizes = [16, 8], strides = [1, 1]} : vector<16x96xf32> to vector<16x8xf32>
    %85 = vector.extract_strided_slice %14 {offsets = [0, 56], sizes = [16, 8], strides = [1, 1]} : vector<16x96xf32> to vector<16x8xf32>
    %86 = vector.extract_strided_slice %14 {offsets = [0, 88], sizes = [16, 8], strides = [1, 1]} : vector<16x96xf32> to vector<16x8xf32>
    %cst_39 = arith.constant dense<0.000000e+00> : vector<16x16xf32>
    %87 = tpu.matmul %84, %85, %cst_39 {dimension_numbers = #tpu.dot_dimension_numbers<[1], [1], [0], [0], [0, 0, 1, 0], [], []>} : vector<16x8xf32>, vector<16x8xf32>, vector<16x16xf32> -> vector<16x16xf32>
    %cst_40 = arith.constant 0.353553385 : f32
    %88 = vector.broadcast %cst_40 : f32 to vector<16x16xf32>
    %89 = arith.mulf %87, %88 : vector<16x16xf32>
    %cst_41 = arith.constant -1.000000e+06 : f32
    %90 = vector.broadcast %cst_41 : f32 to vector<16x16xf32>
    %91 = arith.select %7, %89, %90 : vector<16x16xi1>, vector<16x16xf32>
    %cst_42 = arith.constant dense<0xFF800000> : vector<16xf32>
    %92 = vector.multi_reduction <maximumf>, %91, %cst_42 [1] : vector<16x16xf32> to vector<16xf32>
    %93 = vector.shape_cast %92 : vector<16xf32> to vector<16x1xf32>
    %94 = vector.broadcast %93 : vector<16x1xf32> to vector<16x16xf32>
    %95 = arith.subf %91, %94 : vector<16x16xf32>
    %96 = math.exp %95 : vector<16x16xf32>
    %cst_43 = arith.constant dense<0.000000e+00> : vector<16xf32>
    %97 = vector.multi_reduction <add>, %96, %cst_43 [1] : vector<16x16xf32> to vector<16xf32>
    %98 = vector.shape_cast %97 : vector<16xf32> to vector<16x1xf32>
    %99 = tpu.reciprocal %98 {approx = true} : vector<16x1xf32> -> vector<16x1xf32>
    %100 = vector.broadcast %99 : vector<16x1xf32> to vector<16x16xf32>
    %101 = arith.mulf %96, %100 : vector<16x16xf32>
    %cst_44 = arith.constant dense<0.000000e+00> : vector<16x8xf32>
    %102 = tpu.matmul %101, %86, %cst_44 {dimension_numbers = #tpu.dot_dimension_numbers<[1], [0], [0], [1], [0, 0, 1, 1], [], []>} : vector<16x16xf32>, vector<16x8xf32>, vector<16x8xf32> -> vector<16x8xf32>
    %103 = vector.extract_strided_slice %16 {offsets = [24, 0], sizes = [8, 32], strides = [1, 1]} : vector<32x32xf32> to vector<8x32xf32>
    %cst_45 = arith.constant dense<0.000000e+00> : vector<16x32xf32>
    %104 = tpu.matmul %102, %103, %cst_45 {dimension_numbers = #tpu.dot_dimension_numbers<[1], [0], [0], [1], [0, 0, 1, 1], [], []>} : vector<16x8xf32>, vector<8x32xf32>, vector<16x32xf32> -> vector<16x32xf32>
    %105 = arith.addf %83, %104 : vector<16x32xf32>
    %c0_46 = arith.constant 0 : index
    %c0_47 = arith.constant 0 : index
    %c0_48 = arith.constant 0 : index
    %106 = vector.load %arg7[%c0_46, %c0_47, %c0_48] : memref<2x1x32xf32, #tpu.memory_space<vmem>>, vector<1x1x32xf32>
    %107 = vector.shape_cast %106 : vector<1x1x32xf32> to vector<1x32xf32>
    %108 = vector.broadcast %107 : vector<1x32xf32> to vector<16x32xf32>
    %109 = arith.addf %105, %108 : vector<16x32xf32>
    %110 = arith.addf %4, %109 : vector<16x32xf32>
    %c0_49 = arith.constant 0 : index
    %c0_50 = arith.constant 0 : index
    %c0_51 = arith.constant 0 : index
    %111 = vector.load %arg8[%c0_49, %c0_50, %c0_51] : memref<2x1x32xf32, #tpu.memory_space<vmem>>, vector<1x1x32xf32>
    %112 = vector.shape_cast %111 : vector<1x1x32xf32> to vector<1x32xf32>
    %c0_52 = arith.constant 0 : index
    %c0_53 = arith.constant 0 : index
    %c0_54 = arith.constant 0 : index
    %113 = vector.load %arg9[%c0_52, %c0_53, %c0_54] : memref<2x1x32xf32, #tpu.memory_space<vmem>>, vector<1x1x32xf32>
    %114 = vector.shape_cast %113 : vector<1x1x32xf32> to vector<1x32xf32>
    %cst_55 = arith.constant dense<0.000000e+00> : vector<16xf32>
    %115 = vector.multi_reduction <add>, %110, %cst_55 [1] : vector<16x32xf32> to vector<16xf32>
    %116 = vector.shape_cast %115 : vector<16xf32> to vector<16x1xf32>
    %cst_56 = arith.constant 3.200000e+01 : f32
    %117 = vector.broadcast %cst_56 : f32 to vector<16x1xf32>
    %118 = arith.divf %116, %117 : vector<16x1xf32>
    %119 = vector.broadcast %118 : vector<16x1xf32> to vector<16x32xf32>
    %120 = arith.subf %110, %119 : vector<16x32xf32>
    %121 = arith.mulf %120, %120 : vector<16x32xf32>
    %cst_57 = arith.constant dense<0.000000e+00> : vector<16xf32>
    %122 = vector.multi_reduction <add>, %121, %cst_57 [1] : vector<16x32xf32> to vector<16xf32>
    %123 = vector.shape_cast %122 : vector<16xf32> to vector<16x1xf32>
    %cst_58 = arith.constant 3.200000e+01 : f32
    %124 = vector.broadcast %cst_58 : f32 to vector<16x1xf32>
    %125 = arith.divf %123, %124 : vector<16x1xf32>
    %126 = vector.broadcast %118 : vector<16x1xf32> to vector<16x32xf32>
    %127 = arith.subf %110, %126 : vector<16x32xf32>
    %cst_59 = arith.constant 9.99999974E-6 : f32
    %128 = vector.broadcast %cst_59 : f32 to vector<16x1xf32>
    %129 = arith.addf %125, %128 : vector<16x1xf32>
    %130 = math.rsqrt %129 : vector<16x1xf32>
    %131 = vector.broadcast %130 : vector<16x1xf32> to vector<16x32xf32>
    %132 = arith.mulf %127, %131 : vector<16x32xf32>
    %133 = vector.broadcast %112 : vector<1x32xf32> to vector<16x32xf32>
    %134 = arith.mulf %132, %133 : vector<16x32xf32>
    %135 = vector.broadcast %114 : vector<1x32xf32> to vector<16x32xf32>
    %136 = arith.addf %134, %135 : vector<16x32xf32>
    %c0_60 = arith.constant 0 : index
    %c0_61 = arith.constant 0 : index
    %c0_62 = arith.constant 0 : index
    %137 = vector.load %arg10[%c0_60, %c0_61, %c0_62] : memref<2x32x64xf32, #tpu.memory_space<vmem>>, vector<1x32x64xf32>
    %138 = vector.shape_cast %137 : vector<1x32x64xf32> to vector<32x64xf32>
    %cst_63 = arith.constant dense<0.000000e+00> : vector<16x64xf32>
    %139 = tpu.matmul %136, %138, %cst_63 {dimension_numbers = #tpu.dot_dimension_numbers<[1], [0], [0], [1], [0, 0, 1, 1], [], []>} : vector<16x32xf32>, vector<32x64xf32>, vector<16x64xf32> -> vector<16x64xf32>
    %c0_64 = arith.constant 0 : index
    %c0_65 = arith.constant 0 : index
    %c0_66 = arith.constant 0 : index
    %140 = vector.load %arg11[%c0_64, %c0_65, %c0_66] : memref<2x1x64xf32, #tpu.memory_space<vmem>>, vector<1x1x64xf32>
    %141 = vector.shape_cast %140 : vector<1x1x64xf32> to vector<1x64xf32>
    %142 = vector.broadcast %141 : vector<1x64xf32> to vector<16x64xf32>
    %143 = arith.addf %139, %142 : vector<16x64xf32>
    %cst_67 = arith.constant 0.000000e+00 : f32
    %144 = vector.broadcast %cst_67 : f32 to vector<16x64xf32>
    %145 = arith.maximumf %143, %144 : vector<16x64xf32>
    %c0_68 = arith.constant 0 : index
    %c0_69 = arith.constant 0 : index
    %c0_70 = arith.constant 0 : index
    %146 = vector.load %arg12[%c0_68, %c0_69, %c0_70] : memref<2x64x32xf32, #tpu.memory_space<vmem>>, vector<1x64x32xf32>
    %147 = vector.shape_cast %146 : vector<1x64x32xf32> to vector<64x32xf32>
    %cst_71 = arith.constant dense<0.000000e+00> : vector<16x32xf32>
    %148 = tpu.matmul %145, %147, %cst_71 {dimension_numbers = #tpu.dot_dimension_numbers<[1], [0], [0], [1], [0, 0, 1, 1], [], []>} : vector<16x64xf32>, vector<64x32xf32>, vector<16x32xf32> -> vector<16x32xf32>
    %c0_72 = arith.constant 0 : index
    %c0_73 = arith.constant 0 : index
    %c0_74 = arith.constant 0 : index
    %149 = vector.load %arg13[%c0_72, %c0_73, %c0_74] : memref<2x1x32xf32, #tpu.memory_space<vmem>>, vector<1x1x32xf32>
    %150 = vector.shape_cast %149 : vector<1x1x32xf32> to vector<1x32xf32>
    %151 = vector.broadcast %150 : vector<1x32xf32> to vector<16x32xf32>
    %152 = arith.addf %148, %151 : vector<16x32xf32>
    %153 = arith.addf %136, %152 : vector<16x32xf32>
    %c0_75 = arith.constant 0 : index
    %c0_76 = arith.constant 0 : index
    %c0_77 = arith.constant 0 : index
    %154 = vector.load %arg14[%c0_75, %c0_76, %c0_77] : memref<2x1x32xf32, #tpu.memory_space<vmem>>, vector<1x1x32xf32>
    %155 = vector.shape_cast %154 : vector<1x1x32xf32> to vector<1x32xf32>
    %c0_78 = arith.constant 0 : index
    %c0_79 = arith.constant 0 : index
    %c0_80 = arith.constant 0 : index
    %156 = vector.load %arg15[%c0_78, %c0_79, %c0_80] : memref<2x1x32xf32, #tpu.memory_space<vmem>>, vector<1x1x32xf32>
    %157 = vector.shape_cast %156 : vector<1x1x32xf32> to vector<1x32xf32>
    %cst_81 = arith.constant dense<0.000000e+00> : vector<16xf32>
    %158 = vector.multi_reduction <add>, %153, %cst_81 [1] : vector<16x32xf32> to vector<16xf32>
    %159 = vector.shape_cast %158 : vector<16xf32> to vector<16x1xf32>
    %cst_82 = arith.constant 3.200000e+01 : f32
    %160 = vector.broadcast %cst_82 : f32 to vector<16x1xf32>
    %161 = arith.divf %159, %160 : vector<16x1xf32>
    %162 = vector.broadcast %161 : vector<16x1xf32> to vector<16x32xf32>
    %163 = arith.subf %153, %162 : vector<16x32xf32>
    %164 = arith.mulf %163, %163 : vector<16x32xf32>
    %cst_83 = arith.constant dense<0.000000e+00> : vector<16xf32>
    %165 = vector.multi_reduction <add>, %164, %cst_83 [1] : vector<16x32xf32> to vector<16xf32>
    %166 = vector.shape_cast %165 : vector<16xf32> to vector<16x1xf32>
    %cst_84 = arith.constant 3.200000e+01 : f32
    %167 = vector.broadcast %cst_84 : f32 to vector<16x1xf32>
    %168 = arith.divf %166, %167 : vector<16x1xf32>
    %169 = vector.broadcast %161 : vector<16x1xf32> to vector<16x32xf32>
    %170 = arith.subf %153, %169 : vector<16x32xf32>
    %cst_85 = arith.constant 9.99999974E-6 : f32
    %171 = vector.broadcast %cst_85 : f32 to vector<16x1xf32>
    %172 = arith.addf %168, %171 : vector<16x1xf32>
    %173 = math.rsqrt %172 : vector<16x1xf32>
    %174 = vector.broadcast %173 : vector<16x1xf32> to vector<16x32xf32>
    %175 = arith.mulf %170, %174 : vector<16x32xf32>
    %176 = vector.broadcast %155 : vector<1x32xf32> to vector<16x32xf32>
    %177 = arith.mulf %175, %176 : vector<16x32xf32>
    %178 = vector.broadcast %157 : vector<1x32xf32> to vector<16x32xf32>
    %179 = arith.addf %177, %178 : vector<16x32xf32>
    %c1 = arith.constant 1 : index
    %c0_86 = arith.constant 0 : index
    %c0_87 = arith.constant 0 : index
    %180 = vector.load %arg4[%c1, %c0_86, %c0_87] : memref<2x32x96xf32, #tpu.memory_space<vmem>>, vector<1x32x96xf32>
    %181 = vector.shape_cast %180 : vector<1x32x96xf32> to vector<32x96xf32>
    %cst_88 = arith.constant dense<0.000000e+00> : vector<16x96xf32>
    %182 = tpu.matmul %179, %181, %cst_88 {dimension_numbers = #tpu.dot_dimension_numbers<[1], [0], [0], [1], [0, 0, 1, 1], [], []>} : vector<16x32xf32>, vector<32x96xf32>, vector<16x96xf32> -> vector<16x96xf32>
    %c1_89 = arith.constant 1 : index
    %c0_90 = arith.constant 0 : index
    %c0_91 = arith.constant 0 : index
    %183 = vector.load %arg5[%c1_89, %c0_90, %c0_91] : memref<2x1x96xf32, #tpu.memory_space<vmem>>, vector<1x1x96xf32>
    %184 = vector.shape_cast %183 : vector<1x1x96xf32> to vector<1x96xf32>
    %185 = vector.broadcast %184 : vector<1x96xf32> to vector<16x96xf32>
    %186 = arith.addf %182, %185 : vector<16x96xf32>
    %c1_92 = arith.constant 1 : index
    %c0_93 = arith.constant 0 : index
    %c0_94 = arith.constant 0 : index
    %187 = vector.load %arg6[%c1_92, %c0_93, %c0_94] : memref<2x32x32xf32, #tpu.memory_space<vmem>>, vector<1x32x32xf32>
    %188 = vector.shape_cast %187 : vector<1x32x32xf32> to vector<32x32xf32>
    %cst_95 = arith.constant 0.000000e+00 : f32
    %189 = vector.broadcast %cst_95 : f32 to vector<16x32xf32>
    %190 = vector.extract_strided_slice %186 {offsets = [0, 0], sizes = [16, 8], strides = [1, 1]} : vector<16x96xf32> to vector<16x8xf32>
    %191 = vector.extract_strided_slice %186 {offsets = [0, 32], sizes = [16, 8], strides = [1, 1]} : vector<16x96xf32> to vector<16x8xf32>
    %192 = vector.extract_strided_slice %186 {offsets = [0, 64], sizes = [16, 8], strides = [1, 1]} : vector<16x96xf32> to vector<16x8xf32>
    %cst_96 = arith.constant dense<0.000000e+00> : vector<16x16xf32>
    %193 = tpu.matmul %190, %191, %cst_96 {dimension_numbers = #tpu.dot_dimension_numbers<[1], [1], [0], [0], [0, 0, 1, 0], [], []>} : vector<16x8xf32>, vector<16x8xf32>, vector<16x16xf32> -> vector<16x16xf32>
    %cst_97 = arith.constant 0.353553385 : f32
    %194 = vector.broadcast %cst_97 : f32 to vector<16x16xf32>
    %195 = arith.mulf %193, %194 : vector<16x16xf32>
    %cst_98 = arith.constant -1.000000e+06 : f32
    %196 = vector.broadcast %cst_98 : f32 to vector<16x16xf32>
    %197 = arith.select %7, %195, %196 : vector<16x16xi1>, vector<16x16xf32>
    %cst_99 = arith.constant dense<0xFF800000> : vector<16xf32>
    %198 = vector.multi_reduction <maximumf>, %197, %cst_99 [1] : vector<16x16xf32> to vector<16xf32>
    %199 = vector.shape_cast %198 : vector<16xf32> to vector<16x1xf32>
    %200 = vector.broadcast %199 : vector<16x1xf32> to vector<16x16xf32>
    %201 = arith.subf %197, %200 : vector<16x16xf32>
    %202 = math.exp %201 : vector<16x16xf32>
    %cst_100 = arith.constant dense<0.000000e+00> : vector<16xf32>
    %203 = vector.multi_reduction <add>, %202, %cst_100 [1] : vector<16x16xf32> to vector<16xf32>
    %204 = vector.shape_cast %203 : vector<16xf32> to vector<16x1xf32>
    %205 = tpu.reciprocal %204 {approx = true} : vector<16x1xf32> -> vector<16x1xf32>
    %206 = vector.broadcast %205 : vector<16x1xf32> to vector<16x16xf32>
    %207 = arith.mulf %202, %206 : vector<16x16xf32>
    %cst_101 = arith.constant dense<0.000000e+00> : vector<16x8xf32>
    %208 = tpu.matmul %207, %192, %cst_101 {dimension_numbers = #tpu.dot_dimension_numbers<[1], [0], [0], [1], [0, 0, 1, 1], [], []>} : vector<16x16xf32>, vector<16x8xf32>, vector<16x8xf32> -> vector<16x8xf32>
    %209 = vector.extract_strided_slice %188 {offsets = [0, 0], sizes = [8, 32], strides = [1, 1]} : vector<32x32xf32> to vector<8x32xf32>
    %cst_102 = arith.constant dense<0.000000e+00> : vector<16x32xf32>
    %210 = tpu.matmul %208, %209, %cst_102 {dimension_numbers = #tpu.dot_dimension_numbers<[1], [0], [0], [1], [0, 0, 1, 1], [], []>} : vector<16x8xf32>, vector<8x32xf32>, vector<16x32xf32> -> vector<16x32xf32>
    %211 = arith.addf %189, %210 : vector<16x32xf32>
    %212 = vector.extract_strided_slice %186 {offsets = [0, 8], sizes = [16, 8], strides = [1, 1]} : vector<16x96xf32> to vector<16x8xf32>
    %213 = vector.extract_strided_slice %186 {offsets = [0, 40], sizes = [16, 8], strides = [1, 1]} : vector<16x96xf32> to vector<16x8xf32>
    %214 = vector.extract_strided_slice %186 {offsets = [0, 72], sizes = [16, 8], strides = [1, 1]} : vector<16x96xf32> to vector<16x8xf32>
    %cst_103 = arith.constant dense<0.000000e+00> : vector<16x16xf32>
    %215 = tpu.matmul %212, %213, %cst_103 {dimension_numbers = #tpu.dot_dimension_numbers<[1], [1], [0], [0], [0, 0, 1, 0], [], []>} : vector<16x8xf32>, vector<16x8xf32>, vector<16x16xf32> -> vector<16x16xf32>
    %cst_104 = arith.constant 0.353553385 : f32
    %216 = vector.broadcast %cst_104 : f32 to vector<16x16xf32>
    %217 = arith.mulf %215, %216 : vector<16x16xf32>
    %cst_105 = arith.constant -1.000000e+06 : f32
    %218 = vector.broadcast %cst_105 : f32 to vector<16x16xf32>
    %219 = arith.select %7, %217, %218 : vector<16x16xi1>, vector<16x16xf32>
    %cst_106 = arith.constant dense<0xFF800000> : vector<16xf32>
    %220 = vector.multi_reduction <maximumf>, %219, %cst_106 [1] : vector<16x16xf32> to vector<16xf32>
    %221 = vector.shape_cast %220 : vector<16xf32> to vector<16x1xf32>
    %222 = vector.broadcast %221 : vector<16x1xf32> to vector<16x16xf32>
    %223 = arith.subf %219, %222 : vector<16x16xf32>
    %224 = math.exp %223 : vector<16x16xf32>
    %cst_107 = arith.constant dense<0.000000e+00> : vector<16xf32>
    %225 = vector.multi_reduction <add>, %224, %cst_107 [1] : vector<16x16xf32> to vector<16xf32>
    %226 = vector.shape_cast %225 : vector<16xf32> to vector<16x1xf32>
    %227 = tpu.reciprocal %226 {approx = true} : vector<16x1xf32> -> vector<16x1xf32>
    %228 = vector.broadcast %227 : vector<16x1xf32> to vector<16x16xf32>
    %229 = arith.mulf %224, %228 : vector<16x16xf32>
    %cst_108 = arith.constant dense<0.000000e+00> : vector<16x8xf32>
    %230 = tpu.matmul %229, %214, %cst_108 {dimension_numbers = #tpu.dot_dimension_numbers<[1], [0], [0], [1], [0, 0, 1, 1], [], []>} : vector<16x16xf32>, vector<16x8xf32>, vector<16x8xf32> -> vector<16x8xf32>
    %231 = vector.extract_strided_slice %188 {offsets = [8, 0], sizes = [8, 32], strides = [1, 1]} : vector<32x32xf32> to vector<8x32xf32>
    %cst_109 = arith.constant dense<0.000000e+00> : vector<16x32xf32>
    %232 = tpu.matmul %230, %231, %cst_109 {dimension_numbers = #tpu.dot_dimension_numbers<[1], [0], [0], [1], [0, 0, 1, 1], [], []>} : vector<16x8xf32>, vector<8x32xf32>, vector<16x32xf32> -> vector<16x32xf32>
    %233 = arith.addf %211, %232 : vector<16x32xf32>
    %234 = vector.extract_strided_slice %186 {offsets = [0, 16], sizes = [16, 8], strides = [1, 1]} : vector<16x96xf32> to vector<16x8xf32>
    %235 = vector.extract_strided_slice %186 {offsets = [0, 48], sizes = [16, 8], strides = [1, 1]} : vector<16x96xf32> to vector<16x8xf32>
    %236 = vector.extract_strided_slice %186 {offsets = [0, 80], sizes = [16, 8], strides = [1, 1]} : vector<16x96xf32> to vector<16x8xf32>
    %cst_110 = arith.constant dense<0.000000e+00> : vector<16x16xf32>
    %237 = tpu.matmul %234, %235, %cst_110 {dimension_numbers = #tpu.dot_dimension_numbers<[1], [1], [0], [0], [0, 0, 1, 0], [], []>} : vector<16x8xf32>, vector<16x8xf32>, vector<16x16xf32> -> vector<16x16xf32>
    %cst_111 = arith.constant 0.353553385 : f32
    %238 = vector.broadcast %cst_111 : f32 to vector<16x16xf32>
    %239 = arith.mulf %237, %238 : vector<16x16xf32>
    %cst_112 = arith.constant -1.000000e+06 : f32
    %240 = vector.broadcast %cst_112 : f32 to vector<16x16xf32>
    %241 = arith.select %7, %239, %240 : vector<16x16xi1>, vector<16x16xf32>
    %cst_113 = arith.constant dense<0xFF800000> : vector<16xf32>
    %242 = vector.multi_reduction <maximumf>, %241, %cst_113 [1] : vector<16x16xf32> to vector<16xf32>
    %243 = vector.shape_cast %242 : vector<16xf32> to vector<16x1xf32>
    %244 = vector.broadcast %243 : vector<16x1xf32> to vector<16x16xf32>
    %245 = arith.subf %241, %244 : vector<16x16xf32>
    %246 = math.exp %245 : vector<16x16xf32>
    %cst_114 = arith.constant dense<0.000000e+00> : vector<16xf32>
    %247 = vector.multi_reduction <add>, %246, %cst_114 [1] : vector<16x16xf32> to vector<16xf32>
    %248 = vector.shape_cast %247 : vector<16xf32> to vector<16x1xf32>
    %249 = tpu.reciprocal %248 {approx = true} : vector<16x1xf32> -> vector<16x1xf32>
    %250 = vector.broadcast %249 : vector<16x1xf32> to vector<16x16xf32>
    %251 = arith.mulf %246, %250 : vector<16x16xf32>
    %cst_115 = arith.constant dense<0.000000e+00> : vector<16x8xf32>
    %252 = tpu.matmul %251, %236, %cst_115 {dimension_numbers = #tpu.dot_dimension_numbers<[1], [0], [0], [1], [0, 0, 1, 1], [], []>} : vector<16x16xf32>, vector<16x8xf32>, vector<16x8xf32> -> vector<16x8xf32>
    %253 = vector.extract_strided_slice %188 {offsets = [16, 0], sizes = [8, 32], strides = [1, 1]} : vector<32x32xf32> to vector<8x32xf32>
    %cst_116 = arith.constant dense<0.000000e+00> : vector<16x32xf32>
    %254 = tpu.matmul %252, %253, %cst_116 {dimension_numbers = #tpu.dot_dimension_numbers<[1], [0], [0], [1], [0, 0, 1, 1], [], []>} : vector<16x8xf32>, vector<8x32xf32>, vector<16x32xf32> -> vector<16x32xf32>
    %255 = arith.addf %233, %254 : vector<16x32xf32>
    %256 = vector.extract_strided_slice %186 {offsets = [0, 24], sizes = [16, 8], strides = [1, 1]} : vector<16x96xf32> to vector<16x8xf32>
    %257 = vector.extract_strided_slice %186 {offsets = [0, 56], sizes = [16, 8], strides = [1, 1]} : vector<16x96xf32> to vector<16x8xf32>
    %258 = vector.extract_strided_slice %186 {offsets = [0, 88], sizes = [16, 8], strides = [1, 1]} : vector<16x96xf32> to vector<16x8xf32>
    %cst_117 = arith.constant dense<0.000000e+00> : vector<16x16xf32>
    %259 = tpu.matmul %256, %257, %cst_117 {dimension_numbers = #tpu.dot_dimension_numbers<[1], [1], [0], [0], [0, 0, 1, 0], [], []>} : vector<16x8xf32>, vector<16x8xf32>, vector<16x16xf32> -> vector<16x16xf32>
    %cst_118 = arith.constant 0.353553385 : f32
    %260 = vector.broadcast %cst_118 : f32 to vector<16x16xf32>
    %261 = arith.mulf %259, %260 : vector<16x16xf32>
    %cst_119 = arith.constant -1.000000e+06 : f32
    %262 = vector.broadcast %cst_119 : f32 to vector<16x16xf32>
    %263 = arith.select %7, %261, %262 : vector<16x16xi1>, vector<16x16xf32>
    %cst_120 = arith.constant dense<0xFF800000> : vector<16xf32>
    %264 = vector.multi_reduction <maximumf>, %263, %cst_120 [1] : vector<16x16xf32> to vector<16xf32>
    %265 = vector.shape_cast %264 : vector<16xf32> to vector<16x1xf32>
    %266 = vector.broadcast %265 : vector<16x1xf32> to vector<16x16xf32>
    %267 = arith.subf %263, %266 : vector<16x16xf32>
    %268 = math.exp %267 : vector<16x16xf32>
    %cst_121 = arith.constant dense<0.000000e+00> : vector<16xf32>
    %269 = vector.multi_reduction <add>, %268, %cst_121 [1] : vector<16x16xf32> to vector<16xf32>
    %270 = vector.shape_cast %269 : vector<16xf32> to vector<16x1xf32>
    %271 = tpu.reciprocal %270 {approx = true} : vector<16x1xf32> -> vector<16x1xf32>
    %272 = vector.broadcast %271 : vector<16x1xf32> to vector<16x16xf32>
    %273 = arith.mulf %268, %272 : vector<16x16xf32>
    %cst_122 = arith.constant dense<0.000000e+00> : vector<16x8xf32>
    %274 = tpu.matmul %273, %258, %cst_122 {dimension_numbers = #tpu.dot_dimension_numbers<[1], [0], [0], [1], [0, 0, 1, 1], [], []>} : vector<16x16xf32>, vector<16x8xf32>, vector<16x8xf32> -> vector<16x8xf32>
    %275 = vector.extract_strided_slice %188 {offsets = [24, 0], sizes = [8, 32], strides = [1, 1]} : vector<32x32xf32> to vector<8x32xf32>
    %cst_123 = arith.constant dense<0.000000e+00> : vector<16x32xf32>
    %276 = tpu.matmul %274, %275, %cst_123 {dimension_numbers = #tpu.dot_dimension_numbers<[1], [0], [0], [1], [0, 0, 1, 1], [], []>} : vector<16x8xf32>, vector<8x32xf32>, vector<16x32xf32> -> vector<16x32xf32>
    %277 = arith.addf %255, %276 : vector<16x32xf32>
    %c1_124 = arith.constant 1 : index
    %c0_125 = arith.constant 0 : index
    %c0_126 = arith.constant 0 : index
    %278 = vector.load %arg7[%c1_124, %c0_125, %c0_126] : memref<2x1x32xf32, #tpu.memory_space<vmem>>, vector<1x1x32xf32>
    %279 = vector.shape_cast %278 : vector<1x1x32xf32> to vector<1x32xf32>
    %280 = vector.broadcast %279 : vector<1x32xf32> to vector<16x32xf32>
    %281 = arith.addf %277, %280 : vector<16x32xf32>
    %282 = arith.addf %179, %281 : vector<16x32xf32>
    %c1_127 = arith.constant 1 : index
    %c0_128 = arith.constant 0 : index
    %c0_129 = arith.constant 0 : index
    %283 = vector.load %arg8[%c1_127, %c0_128, %c0_129] : memref<2x1x32xf32, #tpu.memory_space<vmem>>, vector<1x1x32xf32>
    %284 = vector.shape_cast %283 : vector<1x1x32xf32> to vector<1x32xf32>
    %c1_130 = arith.constant 1 : index
    %c0_131 = arith.constant 0 : index
    %c0_132 = arith.constant 0 : index
    %285 = vector.load %arg9[%c1_130, %c0_131, %c0_132] : memref<2x1x32xf32, #tpu.memory_space<vmem>>, vector<1x1x32xf32>
    %286 = vector.shape_cast %285 : vector<1x1x32xf32> to vector<1x32xf32>
    %cst_133 = arith.constant dense<0.000000e+00> : vector<16xf32>
    %287 = vector.multi_reduction <add>, %282, %cst_133 [1] : vector<16x32xf32> to vector<16xf32>
    %288 = vector.shape_cast %287 : vector<16xf32> to vector<16x1xf32>
    %cst_134 = arith.constant 3.200000e+01 : f32
    %289 = vector.broadcast %cst_134 : f32 to vector<16x1xf32>
    %290 = arith.divf %288, %289 : vector<16x1xf32>
    %291 = vector.broadcast %290 : vector<16x1xf32> to vector<16x32xf32>
    %292 = arith.subf %282, %291 : vector<16x32xf32>
    %293 = arith.mulf %292, %292 : vector<16x32xf32>
    %cst_135 = arith.constant dense<0.000000e+00> : vector<16xf32>
    %294 = vector.multi_reduction <add>, %293, %cst_135 [1] : vector<16x32xf32> to vector<16xf32>
    %295 = vector.shape_cast %294 : vector<16xf32> to vector<16x1xf32>
    %cst_136 = arith.constant 3.200000e+01 : f32
    %296 = vector.broadcast %cst_136 : f32 to vector<16x1xf32>
    %297 = arith.divf %295, %296 : vector<16x1xf32>
    %298 = vector.broadcast %290 : vector<16x1xf32> to vector<16x32xf32>
    %299 = arith.subf %282, %298 : vector<16x32xf32>
    %cst_137 = arith.constant 9.99999974E-6 : f32
    %300 = vector.broadcast %cst_137 : f32 to vector<16x1xf32>
    %301 = arith.addf %297, %300 : vector<16x1xf32>
    %302 = math.rsqrt %301 : vector<16x1xf32>
    %303 = vector.broadcast %302 : vector<16x1xf32> to vector<16x32xf32>
    %304 = arith.mulf %299, %303 : vector<16x32xf32>
    %305 = vector.broadcast %284 : vector<1x32xf32> to vector<16x32xf32>
    %306 = arith.mulf %304, %305 : vector<16x32xf32>
    %307 = vector.broadcast %286 : vector<1x32xf32> to vector<16x32xf32>
    %308 = arith.addf %306, %307 : vector<16x32xf32>
    %c1_138 = arith.constant 1 : index
    %c0_139 = arith.constant 0 : index
    %c0_140 = arith.constant 0 : index
    %309 = vector.load %arg10[%c1_138, %c0_139, %c0_140] : memref<2x32x64xf32, #tpu.memory_space<vmem>>, vector<1x32x64xf32>
    %310 = vector.shape_cast %309 : vector<1x32x64xf32> to vector<32x64xf32>
    %cst_141 = arith.constant dense<0.000000e+00> : vector<16x64xf32>
    %311 = tpu.matmul %308, %310, %cst_141 {dimension_numbers = #tpu.dot_dimension_numbers<[1], [0], [0], [1], [0, 0, 1, 1], [], []>} : vector<16x32xf32>, vector<32x64xf32>, vector<16x64xf32> -> vector<16x64xf32>
    %c1_142 = arith.constant 1 : index
    %c0_143 = arith.constant 0 : index
    %c0_144 = arith.constant 0 : index
    %312 = vector.load %arg11[%c1_142, %c0_143, %c0_144] : memref<2x1x64xf32, #tpu.memory_space<vmem>>, vector<1x1x64xf32>
    %313 = vector.shape_cast %312 : vector<1x1x64xf32> to vector<1x64xf32>
    %314 = vector.broadcast %313 : vector<1x64xf32> to vector<16x64xf32>
    %315 = arith.addf %311, %314 : vector<16x64xf32>
    %cst_145 = arith.constant 0.000000e+00 : f32
    %316 = vector.broadcast %cst_145 : f32 to vector<16x64xf32>
    %317 = arith.maximumf %315, %316 : vector<16x64xf32>
    %c1_146 = arith.constant 1 : index
    %c0_147 = arith.constant 0 : index
    %c0_148 = arith.constant 0 : index
    %318 = vector.load %arg12[%c1_146, %c0_147, %c0_148] : memref<2x64x32xf32, #tpu.memory_space<vmem>>, vector<1x64x32xf32>
    %319 = vector.shape_cast %318 : vector<1x64x32xf32> to vector<64x32xf32>
    %cst_149 = arith.constant dense<0.000000e+00> : vector<16x32xf32>
    %320 = tpu.matmul %317, %319, %cst_149 {dimension_numbers = #tpu.dot_dimension_numbers<[1], [0], [0], [1], [0, 0, 1, 1], [], []>} : vector<16x64xf32>, vector<64x32xf32>, vector<16x32xf32> -> vector<16x32xf32>
    %c1_150 = arith.constant 1 : index
    %c0_151 = arith.constant 0 : index
    %c0_152 = arith.constant 0 : index
    %321 = vector.load %arg13[%c1_150, %c0_151, %c0_152] : memref<2x1x32xf32, #tpu.memory_space<vmem>>, vector<1x1x32xf32>
    %322 = vector.shape_cast %321 : vector<1x1x32xf32> to vector<1x32xf32>
    %323 = vector.broadcast %322 : vector<1x32xf32> to vector<16x32xf32>
    %324 = arith.addf %320, %323 : vector<16x32xf32>
    %325 = arith.addf %308, %324 : vector<16x32xf32>
    %c1_153 = arith.constant 1 : index
    %c0_154 = arith.constant 0 : index
    %c0_155 = arith.constant 0 : index
    %326 = vector.load %arg14[%c1_153, %c0_154, %c0_155] : memref<2x1x32xf32, #tpu.memory_space<vmem>>, vector<1x1x32xf32>
    %327 = vector.shape_cast %326 : vector<1x1x32xf32> to vector<1x32xf32>
    %c1_156 = arith.constant 1 : index
    %c0_157 = arith.constant 0 : index
    %c0_158 = arith.constant 0 : index
    %328 = vector.load %arg15[%c1_156, %c0_157, %c0_158] : memref<2x1x32xf32, #tpu.memory_space<vmem>>, vector<1x1x32xf32>
    %329 = vector.shape_cast %328 : vector<1x1x32xf32> to vector<1x32xf32>
    %cst_159 = arith.constant dense<0.000000e+00> : vector<16xf32>
    %330 = vector.multi_reduction <add>, %325, %cst_159 [1] : vector<16x32xf32> to vector<16xf32>
    %331 = vector.shape_cast %330 : vector<16xf32> to vector<16x1xf32>
    %cst_160 = arith.constant 3.200000e+01 : f32
    %332 = vector.broadcast %cst_160 : f32 to vector<16x1xf32>
    %333 = arith.divf %331, %332 : vector<16x1xf32>
    %334 = vector.broadcast %333 : vector<16x1xf32> to vector<16x32xf32>
    %335 = arith.subf %325, %334 : vector<16x32xf32>
    %336 = arith.mulf %335, %335 : vector<16x32xf32>
    %cst_161 = arith.constant dense<0.000000e+00> : vector<16xf32>
    %337 = vector.multi_reduction <add>, %336, %cst_161 [1] : vector<16x32xf32> to vector<16xf32>
    %338 = vector.shape_cast %337 : vector<16xf32> to vector<16x1xf32>
    %cst_162 = arith.constant 3.200000e+01 : f32
    %339 = vector.broadcast %cst_162 : f32 to vector<16x1xf32>
    %340 = arith.divf %338, %339 : vector<16x1xf32>
    %341 = vector.broadcast %333 : vector<16x1xf32> to vector<16x32xf32>
    %342 = arith.subf %325, %341 : vector<16x32xf32>
    %cst_163 = arith.constant 9.99999974E-6 : f32
    %343 = vector.broadcast %cst_163 : f32 to vector<16x1xf32>
    %344 = arith.addf %340, %343 : vector<16x1xf32>
    %345 = math.rsqrt %344 : vector<16x1xf32>
    %346 = vector.broadcast %345 : vector<16x1xf32> to vector<16x32xf32>
    %347 = arith.mulf %342, %346 : vector<16x32xf32>
    %348 = vector.broadcast %327 : vector<1x32xf32> to vector<16x32xf32>
    %349 = arith.mulf %347, %348 : vector<16x32xf32>
    %350 = vector.broadcast %329 : vector<1x32xf32> to vector<16x32xf32>
    %351 = arith.addf %349, %350 : vector<16x32xf32>
    %c0_164 = arith.constant 0 : index
    %c0_165 = arith.constant 0 : index
    %352 = vector.load %arg16[%c0_164, %c0_165] : memref<16x32xf32, #tpu.memory_space<vmem>>, vector<16x32xf32>
    tpu.vector_store %arg16[%c0_164, %c0_165], %351 {strides = array<i32>} : memref<16x32xf32, #tpu.memory_space<vmem>>, vector<16x32xf32>,
    return
  }
}

</mosaic_0001>

<bundles_post_ra>
// kernel: tpu_custom_call.1
= control target key start
LH: loop header
LB: loop body
LE: loop exit
PB: predicated region body
PF: predicated region fallthrough
CT: control target
= control target key end

     0   :  { %s4520_s0 = inlined_call_operand.hbm [shape: f32[16,32], index: 0, kind: input, shape index: {}]   ;;  %s4521_s1 = inlined_call_operand.hbm [shape: f32[16,32], index: 1, kind: input, shape index: {}]   ;;  %s4522_s2 = inlined_call_operand.hbm [shape: f32[16,32], index: 2, kind: input, shape index: {}]   ;;  %s4523_s3 = inlined_call_operand.hbm [shape: f32[16,16], index: 3, kind: input, shape index: {}]   ;;  %s4524_s4 = inlined_call_operand.vmem [shape: f32[2,32,96], index: 4, kind: input, shape index: {}]   ;;  %s4525_s5 = inlined_call_operand.vmem [shape: f32[2,1,96], index: 5, kind: input, shape index: {}]   ;;  %s4526_s6 = inlined_call_operand.vmem [shape: f32[2,32,32], index: 6, kind: input, shape index: {}]   ;;  %s4527_s7 = inlined_call_operand.vmem [shape: f32[2,1,32], index: 7, kind: input, shape index: {}]   ;;  %s4528_s8 = inlined_call_operand.vmem [shape: f32[2,1,32], index: 8, kind: input, shape index: {}]   ;;  %s4529_s9 = inlined_call_operand.vmem [shape: f32[2,1,32], index: 9, kind: input, shape index: {}]   ;;  %s4530_s10 = inlined_call_operand.vmem [shape: f32[2,32,64], index: 10, kind: input, shape index: {}]   ;;  %s4531_s11 = inlined_call_operand.vmem [shape: f32[2,1,64], index: 11, kind: input, shape index: {}]   ;;  %s4532_s12 = inlined_call_operand.vmem [shape: f32[2,64,32], index: 12, kind: input, shape index: {}]   ;;  %s4533_s13 = inlined_call_operand.vmem [shape: f32[2,1,32], index: 13, kind: input, shape index: {}]   ;;  %s4534_s14 = inlined_call_operand.vmem [shape: f32[2,1,32], index: 14, kind: input, shape index: {}]   ;;  %s4535_s15 = inlined_call_operand.vmem [shape: f32[2,1,32], index: 15, kind: input, shape index: {}]   ;;  %s4536_s16 = inlined_call_operand.hbm [shape: f32[16,32], index: 16, kind: output, shape index: {}]  }
   0x1   :  { %4541 = sst [smem:[#allocation15_spill]] %s4520_s0 }
   0x2   :  { %21 = vsyncpa [#allocation3], 0 }
   0x3   :  { %22 = vsyncpa [#allocation6], 0 }
   0x4   :  { %23 = vsyncpa [#allocation9], 0 }
   0x5   :  { %24 = vsyncpa [#allocation4], 0  ;;  %s3911_s21 = smov [#allocation5]   ;;  %s3912_s23 = smov [#allocation2]  }
   0x6   :  { %s42_s22 = sshll.u32 %s3911_s21, 4  ;;  %s30_s24 = sshll.u32 %s3912_s23, 4  ;;  %s43_s22 = int_to_ptr.vmem [resolvable:$true] %s42_s22  ;;  %s31_s24 = int_to_ptr.vmem [resolvable:$true] %s30_s24 }
   0x7   :  { %s3811_s25 = scalar_lea.vmem %s43_s22, 256  ;;  %p3816_p1 = scmp.lt.s32.totalorder %s43_s22, %s43_s22 }
   0x8   :  { %p3812_p0 = scmp.ne.s32.totalorder %s43_s22, %s3811_s25  ;;  %p3817_p2 = scmp.lt.s32.totalorder %s3811_s25, %s3811_s25 }
   0xa   :  { %p3818_p3 = por %p3817_p2, %p3816_p1 }
   0xc   :  { %p3819_p4 = pnand %p3818_p3, %p3812_p0 }
   0xe   :  { %3822 = shalt.err (!%p3819_p4)
}
   0xf   :  { %s4537_s26 = smov 128   ;;  %s4538_s27 = smov 8  }
  0x10   :  { %48 = dma.hbm_to_vmem [thread:$0]  %s4521_s1, 256, %s43_s22, [#allocation6], %s4537_s26, %s4537_s26, %s4538_s27  }
  0x11   :  { %s3831_s30 = scalar_lea.vmem %s31_s24, 256  ;;  %p3836_p6 = scmp.lt.s32.totalorder %s31_s24, %s31_s24 }
  0x12   :  { %p3832_p5 = scmp.ne.s32.totalorder %s31_s24, %s3831_s30  ;;  %p3837_p7 = scmp.lt.s32.totalorder %s3831_s30, %s3831_s30 }
  0x14   :  { %p3838_p8 = por %p3837_p7, %p3836_p6 }
  0x16   :  { %p3839_p9 = pnand %p3838_p8, %p3832_p5 }
  0x18   :  { %3842 = shalt.err (!%p3839_p9)
}
  0x19   :  { %s4542_s18 = sld [smem:[#allocation15_spill]]  ;;  %s3915_s19 = smov [#allocation7]  }
  0x1a   :  { %s54_s20 = sshll.u32 %s3915_s19, 4  ;;  %s3916_s21 = smov [#allocation8]   ;;  %s55_s20 = int_to_ptr.vmem [resolvable:$true] %s54_s20 }
  0x1b   :  { %s66_s23 = sshll.u32 %s3916_s21, 4  ;;  %s3851_s1 = scalar_lea.vmem %s55_s20, 256  ;;  %s67_s23 = int_to_ptr.vmem [resolvable:$true] %s66_s23 }
  0x1c   :  { %p3852_p10 = scmp.ne.s32.totalorder %s55_s20, %s3851_s1  ;;  %p3856_p11 = scmp.lt.s32.totalorder %s55_s20, %s55_s20 }
  0x1d   :  { %p3857_p12 = scmp.lt.s32.totalorder %s3851_s1, %s3851_s1 }
  0x1f   :  { %36 = dma.hbm_to_vmem [thread:$0]  %s4542_s18, 256, %s31_s24, [#allocation3], %s4537_s26, %s4537_s26, %s4538_s27  }
  0x20   :  { %p3858_p13 = por %p3857_p12, %p3856_p11 }
  0x22   :  { %p3859_p0 = pnand %p3858_p13, %p3852_p10 }
  0x24   :  { %3862 = shalt.err (!%p3859_p0)
}
  0x25   :  { %60 = dma.hbm_to_vmem [thread:$0]  %s4522_s2, 256, %s55_s20, [#allocation6], %s4537_s26, %s4537_s26, %s4538_s27  }
  0x26   :  { %s3871_s24 = scalar_lea.vmem %s67_s23, 256  ;;  %p3876_p2 = scmp.lt.s32.totalorder %s67_s23, %s67_s23 }
  0x27   :  { %p3872_p1 = scmp.ne.s32.totalorder %s67_s23, %s3871_s24  ;;  %p3877_p3 = scmp.lt.s32.totalorder %s3871_s24, %s3871_s24 }
  0x29   :  { %p3878_p4 = por %p3877_p3, %p3876_p2 }
  0x2b   :  { %p3879_p5 = pnand %p3878_p4, %p3872_p1 }
  0x2d   :  { %3882 = shalt.err (!%p3879_p5)
}
  0x2e   :  { %72 = dma.hbm_to_vmem [thread:$0]  %s4523_s3, 256, %s67_s23, [#allocation9], %s4537_s26, %s4537_s26, %s4538_s27  }
  0x2f   :  { %3903 = dma.done.wait [#allocation3], 256  }
  0x30   :  { %3904 = vsyncadd [#allocation3], 4294967040 }
  0x31   :  { %3905 = dma.done.wait [#allocation6], 512  }
  0x32   :  { %3906 = vsyncadd [#allocation6], 4294966784 }
  0x33   :  { %3907 = dma.done.wait [#allocation9], 256  }
  0x34   :  { %3908 = vsyncadd [#allocation9], 4294967040  ;;  %v126_v0 = vld [vmem:[%s4524_s4 + $0x18] sm:$0xff]  ;;  %v125_v1 = vld [vmem:[%s4524_s4 + $0x10] sm:$0xff]  ;;  %vm134_vm0 = vcmask 261120   ;;  %vm226_vm1 = vcmask 64512  }
  0x35   :  { %3471 = vmatprep.subr.mxu0 %v126_v0  ;;  %v124_v2 = vld [vmem:[%s4524_s4 + $0x8] sm:$0xff]  ;;  %v109_v3 = vld [vmem:[#allocation2] sm:$0xff]  ;;  %v111_v4 = vld [vmem:[#allocation5] sm:$0xff]  ;;  %s3917_s1 = smov 88   ;;  %s3918_s22 = smov 96   ;;  %vm314_vm3 = vcmask 130048  }
  0x36   :  { %3472 = vmatpush3.msra.mxu0 %v126_v0  ;;  %v113_v5 = vadd.f32 %v111_v4, %v109_v3  ;;  %v115_v6 = vld [vmem:[#allocation7] sm:$0xff]  ;;  %v110_v7 = vld [vmem:[#allocation2 + $0x8] sm:$0xff]  ;;  %v112_v8 = vld [vmem:[#allocation5 + $0x8] sm:$0xff]  ;;  %s3919_s25 = smov 120   ;;  %s3920_s24 = smov 64   ;;  %vm1529_vm5 = vcmask 523264  }
  0x37   :  { %3473 = vmatprep.subr.mxu0 %v125_v1  ;;  %v114_v9 = vadd.f32 %v112_v8, %v110_v7  ;;  %v116_v10 = vld [vmem:[#allocation7 + $0x8] sm:$0xff]  ;;  %v123_v11 = vld [vmem:[%s4524_s4] sm:$0xff]  ;;  %v4091_v25 = vld [vmem:[#allocation8 + $0x8] sm:$0xff]  ;;  %s3921_s28 = smov 56   ;;  %s3922_s29 = smov 80  }
  0x38   :  { %3474 = vmatpush3.msra.mxu0 %v125_v1  ;;  %v4050_v12 = vadd.f32 %v115_v6, %v113_v5  ;;  %v3219_v14 = vld [vmem:[%s4525_s5] ss:$0 sm:$0xff]  ;;  %v4093_v26 = vld [vmem:[#allocation8] sm:$0xff]  ;;  %vm122_vm2 = vcmp.gt.f32.partialorder %v4091_v25, 0.0  ;;  %s3923_s2 = smov 112   ;;  %s3924_s30 = smov 72  }
  0x39   :  { %3475 = vmatprep.subr.mxu0 %v124_v2  ;;  %v4052_v13 = vadd.f32 %v116_v10, %v114_v9  ;;  %vm121_vm4 = vcmp.gt.f32.partialorder %v4093_v26, 0.0  ;;  %s3925_s0 = smov 104   ;;  %s3926_s20 = smov 48  }
  0x3a   :  { %3476 = vmatpush3.msra.mxu0 %v124_v2  ;;  %3479 = vmatprep.mubr.msk.f32.mxu0 %vm134_vm0, %v4050_v12  ;;  %s4539_s21 = smov 40   ;;  %s3928_s19 = smov [#allocation10]  }
  0x3b   :  { %3477 = vmatprep.subr.mxu0 %v123_v11  ;;  %s3205_s3 = sshll.u32 %s3928_s19, 4  ;;  %s3206_s3 = int_to_ptr.vmem [resolvable:$true] %s3205_s3 }
  0x3c   :  { %3478 = vmatpush3.msra.mxu0 %v123_v11  ;;  %s3883_s26 = scalar_lea.vmem %s3206_s3, 256  ;;  %p3888_p7 = scmp.lt.s32.totalorder %s3206_s3, %s3206_s3 }
  0x3d   :  { %3480 = vmatmul.mubr.msk.f32.vlgmr.msra.gmra.mxu0 %vm134_vm0, %v4052_v13  ;;  %p3884_p6 = scmp.ne.s32.totalorder %s3206_s3, %s3883_s26  ;;  %p3889_p8 = scmp.lt.s32.totalorder %s3883_s26, %s3883_s26 }
  0x3f   :  { %p3890_p9 = por %p3889_p8, %p3888_p7 }
  0x41   :  { %p3891_p10 = pnand %p3890_p9, %p3884_p6 }
  0xfd   :  { %v3481_v15 = vpop.f32.mrf.mxu0 }
  0xfe   :  { %v4061_v16 = vadd.f32 %v3481_v15, %v3219_v14 }
  0xff   :  { %v207_v17 = vpop.f32.mrf.mxu0 }
 0x100   :  { %v4063_v18 = vadd.f32 %v3219_v14, %v207_v17  ;;  %430 = vrot.lane.b32.xlu1 %v4061_v16, %s3917_s1  ;;  %224 = vrot.lane.b32.xlu0 %v4061_v16, %s3918_s22 }
 0x102   :  { %3486 = vmatprep.mubr.msk.f32.mxu1 %vm226_vm1, %v4063_v18 }
 0x104   :  { %428 = vrot.lane.b32.xlu1 %v4063_v18, %s3917_s1  ;;  %222 = vrot.lane.b32.xlu0 %v4063_v18, %s3918_s22 }
 0x108   :  { %426 = vrot.lane.b32.xlu1 %v4061_v16, %s3919_s25  ;;  %424 = vrot.lane.b32.xlu0 %v4063_v18, %s3919_s25 }
 0x172   :  { %v225_v19 = vpop.permute.xlu0 %224  ;;  %v431_v20 = vpop.permute.xlu1 %430 }
 0x173   :  { %3482 = vmatprep.subr.msk.mxu1 %vm226_vm1, %v225_v19 }
 0x174   :  { %3483 = vmatpush3.xpose.msk.msra.mxu1 %vm226_vm1, %v225_v19  ;;  %v217_v19 = vld [vmem:[%s4526_s6 + $0x8] sm:$0xff] }
 0x176   :  { %v223_v21 = vpop.permute.xlu0 %222  ;;  %v429_v23 = vpop.permute.xlu1 %428 }
 0x177   :  { %3484 = vmatprep.subr.msk.mxu1 %vm226_vm1, %v223_v21 }
 0x178   :  { %3485 = vmatpush3.xpose.msk.msra.mxu1 %vm226_vm1, %v223_v21 }
 0x179   :  { %3496 = vmatprep.subr.msk.mxu1 %vm226_vm1, %v431_v20 }
 0x17a   :  { %v425_v22 = vpop.permute.xlu0 %424  ;;  %v427_v24 = vpop.permute.xlu1 %426 }
 0x17b   :  { %3487 = vmatmul.mubr.msk.f32.vlgmr.msra.gmra.mxu1 %vm226_vm1, %v4061_v16 }
 0x17c   :  { %3497 = vmatpush3.xpose.msk.msra.mxu1 %vm226_vm1, %v431_v20  ;;  %3500 = vmatprep.mubr.msk.f32.mxu1 %vm226_vm1, %v425_v22  ;;  %v216_v20 = vld [vmem:[%s4526_s6] sm:$0xff] }
 0x17d   :  { %3498 = vmatprep.subr.msk.mxu1 %vm226_vm1, %v429_v23 }
 0x180   :  { %3499 = vmatpush3.xpose.msk.msra.mxu1 %vm226_vm1, %v429_v23 }
 0x183   :  { %3501 = vmatmul.mubr.msk.f32.vlgmr.msra.gmra.mxu1 %vm226_vm1, %v427_v24 }
 0x23b   :  { %v3488_v27 = vpop.f32.mrf.mxu1 }
 0x23c   :  { %v311_v28 = vmul.f32 0.35355338, %v3488_v27 }
 0x23d   :  { %v301_v29 = vpop.f32.mrf.mxu1 }
 0x23e   :  { %v310_v30 = vmul.f32 0.35355338, %v301_v29  ;;  %v313_v31 = vsel %vm122_vm2, %v311_v28, -1000000.0 }
 0x23f   :  { %v318_v32 = vsel %vm314_vm3, %v313_v31, -inf }
 0x240   :  { %319 = vmax.xlane.f32.xlu1 %v318_v32  ;;  %v312_v33 = vsel %vm121_vm4, %v310_v30, -1000000.0 }
 0x241   :  { %v315_v34 = vsel %vm314_vm3, %v312_v33, -inf }
 0x242   :  { %316 = vmax.xlane.f32.xlu0 %v315_v34 }
 0x243   :  { %v3502_v35 = vpop.f32.mrf.mxu1 }
 0x244   :  { %v516_v37 = vmul.f32 0.35355338, %v3502_v35 }
 0x245   :  { %v506_v36 = vpop.f32.mrf.mxu1 }
 0x246   :  { %v515_v38 = vmul.f32 0.35355338, %v506_v36  ;;  %v518_v41 = vsel %vm122_vm2, %v516_v37, -1000000.0 }
 0x247   :  { %v522_v42 = vsel %vm314_vm3, %v518_v41, -inf }
 0x248   :  { %v517_v39 = vsel %vm121_vm4, %v515_v38, -1000000.0 }
 0x249   :  { %v519_v40 = vsel %vm314_vm3, %v517_v39, -inf }
 0x24a   :  { %520 = vmax.xlane.f32.xlu0 %v519_v40 }
 0x24e   :  { %523 = vmax.xlane.f32.xlu0 %v522_v42 }
 0x251   :  { %339 = vrot.lane.b32.xlu1 %v4061_v16, %s3920_s24 }
 0x2c9   :  { %v320_v43 = vpop.xlane.xlu1 %319 }
 0x2ca   :  { %v322_v44 = vsub.f32 %v313_v31, %v320_v43 }
 0x2cb   :  { %v317_v45 = vpop.xlane.xlu0 %316 }
 0x2cc   :  { %v325_v46 = vmul.f32 1.442695, %v322_v44  ;;  %v321_v47 = vsub.f32 %v312_v33, %v317_v45 }
 0x2cd   :  { %v340_v48 = vpop.permute.xlu1 %339 }
 0x2ce   :  { %3723 = vpow2.f32 %v325_v46  ;;  %v323_v49 = vmul.f32 1.442695, %v321_v47  ;;  %3489 = vmatprep.subr.mxu0 %v340_v48 }
 0x2cf   :  { %3490 = vmatpush3.msra.mxu0 %v340_v48 }
 0x2d0   :  { %3725 = vpow2.f32 %v323_v49 }
 0x2d3   :  { %v521_v50 = vpop.xlane.xlu0 %520 }
 0x2d4   :  { %v525_v60 = vsub.f32 %v517_v39, %v521_v50 }
 0x2d6   :  { %v527_v61 = vmul.f32 1.442695, %v525_v60 }
 0x2d7   :  { %v524_v51 = vpop.xlane.xlu0 %523 }
 0x2d8   :  { %v526_v52 = vsub.f32 %v518_v41, %v524_v51 }
 0x2da   :  { %v529_v53 = vmul.f32 1.442695, %v526_v52 }
 0x2db   :  { %v3724_v54 = vpop.eup %3723 }
 0x2dc   :  { %3727 = vpow2.f32 %v529_v53  ;;  %v330_v55 = vsel %vm314_vm3, %v3724_v54, 0.0 }
 0x2dd   :  { %v3726_v56 = vpop.eup %3725  ;;  %331 = vadd.xlane.f32.xlu0 %v330_v55  ;;  %3729 = vpow2.f32 %v527_v61 }
 0x2de   :  { %v327_v57 = vsel %vm314_vm3, %v3726_v56, 0.0 }
 0x2df   :  { %328 = vadd.xlane.f32.xlu1 %v327_v57 }
 0x2e9   :  { %v3728_v58 = vpop.eup %3727 }
 0x2ea   :  { %v534_v59 = vsel %vm314_vm3, %v3728_v58, 0.0  ;;  %v3730_v62 = vpop.eup %3729 }
 0x2eb   :  { %535 = vadd.xlane.f32.xlu0 %v534_v59  ;;  %v531_v63 = vsel %vm314_vm3, %v3730_v62, 0.0 }
 0x2f0   :  { %543 = vrot.lane.b32.xlu1 %v4061_v16, %s3921_s28 }
 0x301   :  { %337 = vrot.lane.b32.xlu0 %v4063_v18, %s3920_s24 }
 0x305   :  { %796 = vrot.lane.b32.xlu0 %v4061_v16, %s3922_s29 }
 0x309   :  { %790 = vrot.lane.b32.xlu0 %v4063_v18, %s3923_s2 }
 0x30d   :  { %1083 = vrot.lane.b32.xlu0 %v4061_v16, %s3924_s30 }
 0x311   :  { %1077 = vrot.lane.b32.xlu0 %v4063_v18, %s3925_s0 }
 0x314   :  { %532 = vadd.xlane.f32.xlu1 %v531_v63 }
 0x325   :  { %541 = vrot.lane.b32.xlu1 %v4063_v18, %s3921_s28 }
 0x329   :  { %794 = vrot.lane.b32.xlu1 %v4063_v18, %s3922_s29 }
 0x32d   :  { %792 = vrot.lane.b32.xlu1 %v4061_v16, %s3923_s2 }
 0x331   :  { %1081 = vrot.lane.b32.xlu1 %v4063_v18, %s3924_s30 }
 0x335   :  { %1079 = vrot.lane.b32.xlu1 %v4061_v16, %s3925_s0 }
 0x366   :  { %v332_v0 = vpop.xlane.xlu0 %331 }
 0x367   :  { %3731 = vrcp.f32 %v332_v0 }
 0x368   :  { %v329_v1 = vpop.xlane.xlu1 %328 }
 0x369   :  { %3733 = vrcp.f32 %v329_v1 }
 0x36c   :  { %v544_v8 = vpop.permute.xlu1 %543 }
 0x374   :  { %v536_v2 = vpop.xlane.xlu0 %535  ;;  %v3732_v3 = vpop.eup %3731 }
 0x375   :  { %v336_v7 = vmul.f32 %v3732_v3, %v3724_v54  ;;  %3735 = vrcp.f32 %v536_v2 }
 0x376   :  { %v3734_v4 = vpop.eup %3733 }
 0x377   :  { %v335_v5 = vmul.f32 %v3734_v4, %v3726_v56 }
 0x378   :  { %v338_v6 = vpop.permute.xlu0 %337 }
 0x379   :  { %3491 = vmatprep.subr.mxu0 %v338_v6  ;;  %3493 = vmatprep.mubr.msk.f32.mxu0 %vm314_vm3, %v335_v5 }
 0x37a   :  { %3492 = vmatpush3.msra.mxu0 %v338_v6 }
 0x37b   :  { %3494 = vmatmul.mubr.msk.f32.vlgmr.msra.gmra.mxu0 %vm314_vm3, %v336_v7  ;;  %3503 = vmatprep.subr.mxu0 %v544_v8 }
 0x37c   :  { %3504 = vmatpush3.msra.mxu0 %v544_v8  ;;  %v797_v22 = vpop.permute.xlu0 %796 }
 0x380   :  { %v791_v28 = vpop.permute.xlu0 %790 }
 0x382   :  { %v3736_v11 = vpop.eup %3735 }
 0x383   :  { %v540_v17 = vmul.f32 %v3736_v11, %v3728_v58 }
 0x384   :  { %v1084_v30 = vpop.permute.xlu0 %1083 }
 0x388   :  { %v1078_v32 = vpop.permute.xlu0 %1077 }
 0x39d   :  { %v533_v9 = vpop.xlane.xlu1 %532 }
 0x39e   :  { %3737 = vrcp.f32 %v533_v9 }
 0x3a1   :  { %v542_v10 = vpop.permute.xlu1 %541 }
 0x3a2   :  { %3505 = vmatprep.subr.mxu0 %v542_v10 }
 0x3a3   :  { %3506 = vmatpush3.msra.mxu0 %v542_v10 }
 0x3a4   :  { %3510 = vmatprep.subr.mxu0 %v217_v19 }
 0x3a5   :  { %v795_v29 = vpop.permute.xlu1 %794 }
 0x3a9   :  { %v793_v31 = vpop.permute.xlu1 %792 }
 0x3ab   :  { %v3738_v14 = vpop.eup %3737 }
 0x3ac   :  { %v539_v15 = vmul.f32 %v3738_v14, %v3730_v62  ;;  %v218_v14 = vld [vmem:[%s4526_s6 + $0x10] sm:$0xff] }
 0x3ad   :  { %v1082_v33 = vpop.permute.xlu1 %1081 }
 0x3ae   :  { %3507 = vmatprep.mubr.msk.f32.mxu0 %vm314_vm3, %v539_v15 }
 0x3af   :  { %3508 = vmatmul.mubr.msk.f32.vlgmr.msra.gmra.mxu0 %vm314_vm3, %v540_v17 }
 0x3b0   :  { %3511 = vmatpush3.msra.mxu0 %v217_v19 }
 0x3b1   :  { %3515 = vmatprep.subr.mxu0 %v216_v20  ;;  %v1080_v34 = vpop.permute.xlu1 %1079 }
 0x43b   :  { %v3495_v21 = vpop.f32.mrf.mxu0 }
 0x43d   :  { %v415_v23 = vpop.f32.mrf.mxu0 }
 0x46f   :  { %v3509_v24 = vpop.f32.mrf.mxu0 }
 0x471   :  { %v619_v27 = vpop.f32.mrf.mxu0 }
 0x472   :  { %3512 = vmatprep.mubr.msk.f32.mxu0 %vm226_vm1, %v619_v27 }
 0x473   :  { %3513 = vmatmul.mubr.msk.f32.vlgmr.msra.gmra.mxu0 %vm226_vm1, %v3509_v24 }
 0x474   :  { %3516 = vmatpush3.msra.mxu0 %v216_v20  ;;  %3517 = vmatprep.mubr.msk.f32.mxu0 %vm226_vm1, %v415_v23 }
 0x475   :  { %3520 = vmatprep.subr.msk.mxu0 %vm226_vm1, %v797_v22 }
 0x477   :  { %3518 = vmatmul.mubr.msk.f32.vlgmr.msra.gmra.mxu0 %vm226_vm1, %v3495_v21 }
 0x478   :  { %3521 = vmatpush3.xpose.msk.msra.mxu0 %vm226_vm1, %v797_v22  ;;  %3524 = vmatprep.mubr.msk.f32.mxu0 %vm226_vm1, %v791_v28 }
 0x479   :  { %3522 = vmatprep.subr.msk.mxu0 %vm226_vm1, %v795_v29 }
 0x47c   :  { %3523 = vmatpush3.xpose.msk.msra.mxu0 %vm226_vm1, %v795_v29 }
 0x47d   :  { %3539 = vmatprep.subr.msk.mxu0 %vm226_vm1, %v1084_v30 }
 0x47f   :  { %3525 = vmatmul.mubr.msk.f32.vlgmr.msra.gmra.mxu0 %vm226_vm1, %v793_v31 }
 0x480   :  { %3540 = vmatpush3.xpose.msk.msra.mxu0 %vm226_vm1, %v1084_v30  ;;  %3543 = vmatprep.mubr.msk.f32.mxu0 %vm226_vm1, %v1078_v32 }
 0x481   :  { %3541 = vmatprep.subr.msk.mxu0 %vm226_vm1, %v1082_v33 }
 0x484   :  { %3542 = vmatpush3.xpose.msk.msra.mxu0 %vm226_vm1, %v1082_v33 }
 0x487   :  { %3544 = vmatmul.mubr.msk.f32.vlgmr.msra.gmra.mxu0 %vm226_vm1, %v1080_v34 }
 0x533   :  { %v3514_v35 = vpop.f32.mrf.mxu0 }
 0x535   :  { %v700_v36 = vpop.f32.mrf.mxu0 }
 0x537   :  { %v3519_v37 = vpop.f32.mrf.mxu0 }
 0x538   :  { %v4163_v38 = vadd.f32 %v3519_v37, %v3514_v35 }
 0x539   :  { %v781_v39 = vpop.f32.mrf.mxu0 }
 0x53a   :  { %v4165_v40 = vadd.f32 %v781_v39, %v700_v36 }
 0x53f   :  { %v3526_v41 = vpop.f32.mrf.mxu0 }
 0x540   :  { %v882_v42 = vmul.f32 0.35355338, %v3526_v41 }
 0x541   :  { %v872_v43 = vpop.f32.mrf.mxu0 }
 0x542   :  { %v881_v44 = vmul.f32 0.35355338, %v872_v43  ;;  %v884_v45 = vsel %vm122_vm2, %v882_v42, -1000000.0 }
 0x543   :  { %v888_v46 = vsel %vm314_vm3, %v884_v45, -inf }
 0x544   :  { %889 = vmax.xlane.f32.xlu1 %v888_v46  ;;  %v883_v47 = vsel %vm121_vm4, %v881_v44, -1000000.0  ;;  %v3254_v46 = vld [vmem:[%s4527_s7] ss:$0 sm:$0xff] }
 0x545   :  { %v885_v48 = vsel %vm314_vm3, %v883_v47, -inf }
 0x546   :  { %886 = vmax.xlane.f32.xlu0 %v885_v48 }
 0x547   :  { %v3545_v49 = vpop.f32.mrf.mxu0 }
 0x548   :  { %v1169_v4 = vmul.f32 0.35355338, %v3545_v49 }
 0x549   :  { %v1159_v50 = vpop.f32.mrf.mxu0 }
 0x54a   :  { %v1168_v51 = vmul.f32 0.35355338, %v1159_v50  ;;  %v1171_v7 = vsel %vm122_vm2, %v1169_v4, -1000000.0  ;;  %v1519_v4 = vld [vmem:[%s4532_s12 + $0x28] sm:$0xff] }
 0x54b   :  { %v1175_v8 = vsel %vm314_vm3, %v1171_v7, -inf }
 0x54c   :  { %v1170_v52 = vsel %vm121_vm4, %v1168_v51, -1000000.0 }
 0x54d   :  { %v1172_v53 = vsel %vm314_vm3, %v1170_v52, -inf }
 0x555   :  { %909 = vrot.lane.b32.xlu1 %v4061_v16, %s3926_s20 }
 0x579   :  { %1173 = vmax.xlane.f32.xlu1 %v1172_v53 }
 0x5cd   :  { %v890_v54 = vpop.xlane.xlu1 %889 }
 0x5ce   :  { %v892_v55 = vsub.f32 %v884_v45, %v890_v54 }
 0x5cf   :  { %v887_v56 = vpop.xlane.xlu0 %886 }
 0x5d0   :  { %v895_v57 = vmul.f32 1.442695, %v892_v55  ;;  %v891_v58 = vsub.f32 %v883_v47, %v887_v56 }
 0x5d1   :  { %v910_v59 = vpop.permute.xlu1 %909 }
 0x5d2   :  { %3739 = vpow2.f32 %v895_v57  ;;  %v893_v60 = vmul.f32 1.442695, %v891_v58  ;;  %3527 = vmatprep.subr.mxu1 %v910_v59 }
 0x5d3   :  { %3528 = vmatpush3.msra.mxu1 %v910_v59 }
 0x5d4   :  { %3741 = vpow2.f32 %v893_v60 }
 0x5df   :  { %v3740_v61 = vpop.eup %3739 }
 0x5e0   :  { %v900_v62 = vsel %vm314_vm3, %v3740_v61, 0.0 }
 0x5e1   :  { %v3742_v63 = vpop.eup %3741  ;;  %901 = vadd.xlane.f32.xlu0 %v900_v62 }
 0x5e2   :  { %v897_v0 = vsel %vm314_vm3, %v3742_v63, 0.0 }
 0x5e5   :  { %898 = vadd.xlane.f32.xlu0 %v897_v0  ;;  %v1421_v0 = vld [vmem:[%s4530_s10 + $0x8] sm:$0xff] }
 0x5fb   :  { %907 = vrot.lane.b32.xlu0 %v4063_v18, %s3926_s20 }
 0x602   :  { %v1174_v1 = vpop.xlane.xlu1 %1173 }
 0x603   :  { %v1178_v2 = vsub.f32 %v1170_v52, %v1174_v1  ;;  %v1420_v1 = vld [vmem:[%s4530_s10] sm:$0xff] }
 0x605   :  { %v1180_v3 = vmul.f32 1.442695, %v1178_v2  ;;  %v1521_v2 = vld [vmem:[%s4532_s12 + $0x38] sm:$0xff] }
 0x607   :  { %3743 = vpow2.f32 %v1180_v3  ;;  %v1520_v3 = vld [vmem:[%s4532_s12 + $0x30] sm:$0xff] }
 0x614   :  { %v3744_v5 = vpop.eup %3743 }
 0x615   :  { %v1184_v6 = vsel %vm314_vm3, %v3744_v5, 0.0 }
 0x616   :  { %1185 = vadd.xlane.f32.xlu1 %v1184_v6 }
 0x61a   :  { %1176 = vmax.xlane.f32.xlu0 %v1175_v8 }
 0x627   :  { %1196 = vrot.lane.b32.xlu1 %v4061_v16, %s4539_s21 }
 0x66a   :  { %v902_v9 = vpop.xlane.xlu0 %901 }
 0x66b   :  { %3745 = vrcp.f32 %v902_v9 }
 0x66e   :  { %v899_v10 = vpop.xlane.xlu0 %898 }
 0x66f   :  { %3747 = vrcp.f32 %v899_v10 }
 0x672   :  { %v908_v11 = vpop.permute.xlu0 %907 }
 0x673   :  { %3529 = vmatprep.subr.mxu1 %v908_v11 }
 0x674   :  { %3530 = vmatpush3.msra.mxu1 %v908_v11 }
 0x675   :  { %3534 = vmatprep.subr.mxu1 %v218_v14 }
 0x678   :  { %v3746_v15 = vpop.eup %3745 }
 0x679   :  { %v906_v20 = vmul.f32 %v3746_v15, %v3740_v61  ;;  %v3255_v15 = vld [vmem:[%s4528_s8] ss:$0 sm:$0xff] }
 0x67c   :  { %v3748_v17 = vpop.eup %3747 }
 0x67d   :  { %v905_v19 = vmul.f32 %v3748_v17, %v3742_v63  ;;  %v1422_v63 = vld [vmem:[%s4530_s10 + $0x10] sm:$0xff] }
 0x67f   :  { %3531 = vmatprep.mubr.msk.f32.mxu1 %vm314_vm3, %v905_v19 }
 0x680   :  { %3532 = vmatmul.mubr.msk.f32.vlgmr.msra.gmra.mxu1 %vm314_vm3, %v906_v20 }
 0x681   :  { %3535 = vmatpush3.msra.mxu1 %v218_v14 }
 0x69f   :  { %v1186_v16 = vpop.xlane.xlu1 %1185 }
 0x6a3   :  { %v1197_v21 = vpop.permute.xlu1 %1196  ;;  %v1177_v22 = vpop.xlane.xlu0 %1176 }
 0x6a4   :  { %v1179_v23 = vsub.f32 %v1171_v7, %v1177_v22  ;;  %3546 = vmatprep.subr.mxu1 %v1197_v21 }
 0x6a6   :  { %v1182_v24 = vmul.f32 1.442695, %v1179_v23 }
 0x6a8   :  { %3749 = vpow2.f32 %v1182_v24 }
 0x6a9   :  { %3751 = vrcp.f32 %v1186_v16 }
 0x6b5   :  { %v3750_v27 = vpop.eup %3749 }
 0x6b6   :  { %v1187_v28 = vsel %vm314_vm3, %v3750_v27, 0.0  ;;  %v3752_v29 = vpop.eup %3751 }
 0x6b7   :  { %1188 = vadd.xlane.f32.xlu0 %v1187_v28  ;;  %v1192_v33 = vmul.f32 %v3752_v29, %v3744_v5  ;;  %v1518_v5 = vld [vmem:[%s4532_s12 + $0x20] sm:$0xff]  ;;  %v1516_v28 = vld [vmem:[%s4532_s12 + $0x10] sm:$0xff]  ;;  %v1515_v29 = vld [vmem:[%s4532_s12 + $0x8] sm:$0xff] }
 0x6cd   :  { %1194 = vrot.lane.b32.xlu0 %v4063_v18, %s4539_s21  ;;  %v219_v18 = vld [vmem:[%s4526_s6 + $0x18] sm:$0xff] }
 0x740   :  { %v3533_v30 = vpop.f32.mrf.mxu1  ;;  %v1189_v31 = vpop.xlane.xlu0 %1188 }
 0x741   :  { %3753 = vrcp.f32 %v1189_v31  ;;  %v3257_v31 = vld [vmem:[%s4531_s11] ss:$0 sm:$0xff] }
 0x742   :  { %v985_v32 = vpop.f32.mrf.mxu1 }
 0x743   :  { %3536 = vmatprep.mubr.msk.f32.mxu1 %vm226_vm1, %v985_v32 }
 0x744   :  { %3537 = vmatmul.mubr.msk.f32.vlgmr.msra.gmra.mxu1 %vm226_vm1, %v3533_v30  ;;  %v1195_v34 = vpop.permute.xlu0 %1194  ;;  %v1514_v30 = vld [vmem:[%s4532_s12] sm:$0xff] }
 0x745   :  { %3547 = vmatpush3.msra.mxu1 %v1197_v21  ;;  %3550 = vmatprep.mubr.msk.f32.mxu1 %vm314_vm3, %v1192_v33  ;;  %v3256_v21 = vld [vmem:[%s4529_s9] ss:$0 sm:$0xff] }
 0x746   :  { %3548 = vmatprep.subr.mxu1 %v1195_v34 }
 0x747   :  { %3549 = vmatpush3.msra.mxu1 %v1195_v34 }
 0x748   :  { %3553 = vmatprep.subr.mxu1 %v219_v18 }
 0x74e   :  { %v3754_v35 = vpop.eup %3753 }
 0x74f   :  { %v1193_v36 = vmul.f32 %v3754_v35, %v3750_v27  ;;  %v1517_v27 = vld [vmem:[%s4532_s12 + $0x18] sm:$0xff] }
 0x751   :  { %3551 = vmatmul.mubr.msk.f32.vlgmr.msra.gmra.mxu1 %vm314_vm3, %v1193_v36 }
 0x752   :  { %3554 = vmatpush3.msra.mxu1 %v219_v18 }
 0x753   :  { %3569 = vmatprep.subr.mxu1 %v1521_v2 }
 0x804   :  { %v3538_v37 = vpop.f32.mrf.mxu1 }
 0x805   :  { %v1076_v39 = vadd.f32 %v3538_v37, %v4163_v38  ;;  %v3260_v37 = vld [vmem:[%s4533_s13] ss:$0 sm:$0xff] }
 0x806   :  { %v1066_v41 = vpop.f32.mrf.mxu1 }
 0x807   :  { %v1075_v42 = vadd.f32 %v1066_v41, %v4165_v40 }
 0x811   :  { %v3552_v43 = vpop.f32.mrf.mxu1 }
 0x813   :  { %v1272_v44 = vpop.f32.mrf.mxu1 }
 0x814   :  { %3555 = vmatprep.mubr.msk.f32.mxu1 %vm226_vm1, %v1272_v44 }
 0x815   :  { %3556 = vmatmul.mubr.msk.f32.vlgmr.msra.gmra.mxu1 %vm226_vm1, %v3552_v43 }
 0x816   :  { %3570 = vmatpush3.msra.mxu1 %v1521_v2 }
 0x817   :  { %3571 = vmatprep.subr.mxu1 %v1520_v3 }
 0x818   :  { %3572 = vmatpush3.msra.mxu1 %v1520_v3 }
 0x819   :  { %3573 = vmatprep.subr.mxu1 %v1519_v4 }
 0x81a   :  { %3574 = vmatpush3.msra.mxu1 %v1519_v4 }
 0x81b   :  { %3575 = vmatprep.subr.mxu1 %v1518_v5 }
 0x81c   :  { %3576 = vmatpush3.msra.mxu1 %v1518_v5 }
 0x81d   :  { %3577 = vmatprep.subr.mxu1 %v1517_v27 }
 0x81e   :  { %3578 = vmatpush3.msra.mxu1 %v1517_v27 }
 0x81f   :  { %3579 = vmatprep.subr.mxu1 %v1516_v28 }
 0x820   :  { %3580 = vmatpush3.msra.mxu1 %v1516_v28 }
 0x821   :  { %3581 = vmatprep.subr.mxu1 %v1515_v29 }
 0x822   :  { %3582 = vmatpush3.msra.mxu1 %v1515_v29 }
 0x823   :  { %3583 = vmatprep.subr.mxu1 %v1514_v30 }
 0x824   :  { %3584 = vmatpush3.msra.mxu1 %v1514_v30 }
 0x8d5   :  { %v3557_v45 = vpop.f32.mrf.mxu1 }
 0x8d6   :  { %v1363_v47 = vadd.f32 %v3557_v45, %v1076_v39 }
 0x8d7   :  { %v1353_v48 = vpop.f32.mrf.mxu1 }
 0x8d8   :  { %v1372_v49 = vadd.f32 %v3254_v46, %v1363_v47  ;;  %v1362_v50 = vadd.f32 %v1353_v48, %v1075_v42 }
 0x8da   :  { %v1371_v51 = vadd.f32 %v3254_v46, %v1362_v50  ;;  %v1374_v38 = vadd.f32 %v1372_v49, %v4052_v13 }
 0x8dc   :  { %v1380_v40 = vsel %vm134_vm0, %v1374_v38, 0.0  ;;  %v1373_v52 = vadd.f32 %v1371_v51, %v4050_v12  ;;  %v1423_v12 = vld [vmem:[%s4530_s10 + $0x18] sm:$0xff] }
 0x8dd   :  { %1381 = vadd.xlane.f32.xlu0 %v1380_v40  ;;  %3558 = vmatprep.subr.mxu0 %v1423_v12 }
 0x8de   :  { %v1377_v53 = vsel %vm134_vm0, %v1373_v52, 0.0  ;;  %3559 = vmatpush3.msra.mxu0 %v1423_v12 }
 0x8df   :  { %1378 = vadd.xlane.f32.xlu1 %v1377_v53  ;;  %3560 = vmatprep.subr.mxu0 %v1422_v63 }
 0x8e0   :  { %3561 = vmatpush3.msra.mxu0 %v1422_v63 }
 0x8e1   :  { %3562 = vmatprep.subr.mxu0 %v1421_v0 }
 0x8e2   :  { %3563 = vmatpush3.msra.mxu0 %v1421_v0 }
 0x8e3   :  { %3564 = vmatprep.subr.mxu0 %v1420_v1 }
 0x8e4   :  { %3565 = vmatpush3.msra.mxu0 %v1420_v1  ;;  %v3263_v1 = vld [vmem:[%s4534_s14] ss:$0 sm:$0xff] }
 0x966   :  { %v1382_v54 = vpop.xlane.xlu0 %1381 }
 0x967   :  { %v1385_v55 = vmul.f32 0.03125, %v1382_v54 }
 0x968   :  { %v1379_v56 = vpop.xlane.xlu1 %1378 }
 0x969   :  { %v1387_v57 = vsub.f32 %v1374_v38, %v1385_v55  ;;  %v1384_v58 = vmul.f32 0.03125, %v1379_v56  ;;  %v3268_v56 = vld [vmem:[%s4524_s4 + $0x38] sm:$0xff] }
 0x96a   :  { %3588 = vmatprep.subr.mxu0 %v3268_v56 }
 0x96b   :  { %v1386_v59 = vsub.f32 %v1373_v52, %v1384_v58  ;;  %v1389_v60 = vmul.f32 %v1387_v57, %v1387_v57  ;;  %v3266_v58 = vld [vmem:[%s4524_s4 + $0x28] sm:$0xff] }
 0x96d   :  { %v1393_v61 = vsel %vm134_vm0, %v1389_v60, 0.0  ;;  %v1388_v62 = vmul.f32 %v1386_v59, %v1386_v59 }
 0x96e   :  { %1394 = vadd.xlane.f32.xlu0 %v1393_v61 }
 0x96f   :  { %v1390_v13 = vsel %vm134_vm0, %v1388_v62, 0.0 }
 0x970   :  { %1391 = vadd.xlane.f32.xlu1 %v1390_v13 }
 0x9f7   :  { %v1395_v6 = vpop.xlane.xlu0 %1394 }
 0x9f8   :  { %v1397_v7 = vmul.f32 0.03125, %v1395_v6  ;;  %v3264_v6 = vld [vmem:[%s4535_s15] ss:$0 sm:$0xff] }
 0x9f9   :  { %v1392_v8 = vpop.xlane.xlu1 %1391 }
 0x9fa   :  { %v1399_v9 = vadd.f32 1e-05, %v1397_v7  ;;  %v1396_v10 = vmul.f32 0.03125, %v1392_v8 }
 0x9fc   :  { %3755 = vrsqrt.f32 %v1399_v9  ;;  %v1398_v11 = vadd.f32 1e-05, %v1396_v10  ;;  %v3270_v10 = vld [vmem:[%s4525_s5 + $0x1] ss:$0 sm:$0xff] }
 0x9fe   :  { %3757 = vrsqrt.f32 %v1398_v11 }
 0xa09   :  { %v3756_v14 = vpop.eup %3755 }
 0xa0a   :  { %v1403_v17 = vmul.f32 %v3756_v14, %v1387_v57  ;;  %v3267_v57 = vld [vmem:[%s4524_s4 + $0x30] sm:$0xff] }
 0xa0b   :  { %v3758_v19 = vpop.eup %3757 }
 0xa0c   :  { %v1402_v20 = vmul.f32 %v3758_v19, %v1386_v59  ;;  %v1411_v16 = vmul.f32 %v3255_v15, %v1403_v17  ;;  %v3265_v59 = vld [vmem:[%s4524_s4 + $0x20] sm:$0xff] }
 0xa0e   :  { %v1410_v22 = vmul.f32 %v3255_v15, %v1402_v20  ;;  %v1419_v24 = vadd.f32 %v3256_v21, %v1411_v16 }
 0xa10   :  { %v1418_v23 = vadd.f32 %v3256_v21, %v1410_v22 }
 0xa12   :  { %3566 = vmatprep.mubr.msk.f32.mxu0 %vm134_vm0, %v1418_v23 }
 0xa13   :  { %3567 = vmatmul.mubr.msk.f32.vlgmr.msra.gmra.mxu0 %vm134_vm0, %v1419_v24 }
 0xa14   :  { %3589 = vmatpush3.msra.mxu0 %v3268_v56 }
 0xa15   :  { %3590 = vmatprep.subr.mxu0 %v3267_v57 }
 0xa16   :  { %3591 = vmatpush3.msra.mxu0 %v3267_v57 }
 0xa17   :  { %3592 = vmatprep.subr.mxu0 %v3266_v58 }
 0xa18   :  { %3593 = vmatpush3.msra.mxu0 %v3266_v58 }
 0xa19   :  { %3594 = vmatprep.subr.mxu0 %v3265_v59 }
 0xa1a   :  { %3595 = vmatpush3.msra.mxu0 %v3265_v59 }
 0xad3   :  { %v3568_v32 = vpop.f32.mrf.mxu0 }
 0xad4   :  { %v1509_v33 = vadd.f32 %v3568_v32, %v3257_v31 }
 0xad5   :  { %v1503_v34 = vpop.f32.mrf.mxu0 }
 0xad6   :  { %v1504_v35 = vadd.f32 %v3257_v31, %v1503_v34  ;;  %v1513_v18 = vmax.f32 %v1509_v33, 0.0 }
 0xad8   :  { %v1512_v36 = vmax.f32 %v1504_v35, 0.0 }
 0xada   :  { %3585 = vmatprep.mubr.msk.f32.mxu1 %vm1529_vm5, %v1512_v36 }
 0xadb   :  { %3586 = vmatmul.mubr.msk.f32.vlgmr.msra.gmra.mxu1 %vm1529_vm5, %v1513_v18 }
 0xb9b   :  { %v3587_v39 = vpop.f32.mrf.mxu1 }
 0xb9c   :  { %v1608_v41 = vadd.f32 %v3587_v39, %v3260_v37 }
 0xb9d   :  { %v1602_v42 = vpop.f32.mrf.mxu1 }
 0xb9e   :  { %v1603_v43 = vadd.f32 %v3260_v37, %v1602_v42  ;;  %v1612_v44 = vadd.f32 %v1608_v41, %v1419_v24 }
 0xba0   :  { %v1618_v45 = vsel %vm134_vm0, %v1612_v44, 0.0  ;;  %v1611_v46 = vadd.f32 %v1603_v43, %v1418_v23 }
 0xba1   :  { %1619 = vadd.xlane.f32.xlu0 %v1618_v45 }
 0xba2   :  { %v1615_v47 = vsel %vm134_vm0, %v1611_v46, 0.0 }
 0xba3   :  { %1616 = vadd.xlane.f32.xlu1 %v1615_v47 }
 0xc2a   :  { %v1620_v48 = vpop.xlane.xlu0 %1619 }
 0xc2b   :  { %v1622_v49 = vmul.f32 0.03125, %v1620_v48 }
 0xc2c   :  { %v1617_v50 = vpop.xlane.xlu1 %1616 }
 0xc2d   :  { %v1624_v51 = vsub.f32 %v1612_v44, %v1622_v49  ;;  %v1621_v38 = vmul.f32 0.03125, %v1617_v50 }
 0xc2f   :  { %v1623_v40 = vsub.f32 %v1611_v46, %v1621_v38  ;;  %v1626_v52 = vmul.f32 %v1624_v51, %v1624_v51 }
 0xc31   :  { %v1630_v53 = vsel %vm134_vm0, %v1626_v52, 0.0  ;;  %v1625_v54 = vmul.f32 %v1623_v40, %v1623_v40 }
 0xc32   :  { %1631 = vadd.xlane.f32.xlu0 %v1630_v53 }
 0xc33   :  { %v1627_v55 = vsel %vm134_vm0, %v1625_v54, 0.0 }
 0xc34   :  { %1628 = vadd.xlane.f32.xlu1 %v1627_v55 }
 0xcbb   :  { %v1632_v60 = vpop.xlane.xlu0 %1631 }
 0xcbc   :  { %v1634_v61 = vmul.f32 0.03125, %v1632_v60 }
 0xcbd   :  { %v1629_v62 = vpop.xlane.xlu1 %1628 }
 0xcbe   :  { %v1636_v13 = vadd.f32 1e-05, %v1634_v61  ;;  %v1633_v12 = vmul.f32 0.03125, %v1629_v62 }
 0xcc0   :  { %3759 = vrsqrt.f32 %v1636_v13  ;;  %v1635_v63 = vadd.f32 1e-05, %v1633_v12 }
 0xcc2   :  { %3761 = vrsqrt.f32 %v1635_v63 }
 0xccd   :  { %v3760_v0 = vpop.eup %3759 }
 0xcce   :  { %v1640_v2 = vmul.f32 %v3760_v0, %v1624_v51 }
 0xccf   :  { %v3762_v3 = vpop.eup %3761 }
 0xcd0   :  { %v1639_v4 = vmul.f32 %v3762_v3, %v1623_v40  ;;  %v1648_v5 = vmul.f32 %v3263_v1, %v1640_v2  ;;  %v3273_v40 = vld [vmem:[%s4526_s6 + $0x20] sm:$0xff] }
 0xcd2   :  { %v1647_v7 = vmul.f32 %v3263_v1, %v1639_v4  ;;  %v4292_v9 = vadd.f32 %v3264_v6, %v1648_v5 }
 0xcd4   :  { %v4290_v8 = vadd.f32 %v3264_v6, %v1647_v7 }
 0xcd6   :  { %3596 = vmatprep.mubr.msk.f32.mxu0 %vm134_vm0, %v4290_v8 }
 0xcd7   :  { %3597 = vmatmul.mubr.msk.f32.vlgmr.msra.gmra.mxu0 %vm134_vm0, %v4292_v9 }
 0xd97   :  { %v3598_v11 = vpop.f32.mrf.mxu0 }
 0xd98   :  { %v4301_v14 = vadd.f32 %v3598_v11, %v3270_v10 }
 0xd99   :  { %v1742_v15 = vpop.f32.mrf.mxu0 }
 0xd9a   :  { %v4303_v17 = vadd.f32 %v3270_v10, %v1742_v15  ;;  %1760 = vrot.lane.b32.xlu1 %v4301_v14, %s3918_s22  ;;  %v3274_v15 = vld [vmem:[%s4526_s6 + $0x28] sm:$0xff] }
 0xd9c   :  { %1758 = vrot.lane.b32.xlu0 %v4303_v17, %s3918_s22  ;;  %3603 = vmatprep.mubr.msk.f32.mxu0 %vm226_vm1, %v4303_v17 }
 0xe0c   :  { %v1761_v19 = vpop.permute.xlu1 %1760 }
 0xe0d   :  { %3599 = vmatprep.subr.msk.mxu0 %vm226_vm1, %v1761_v19 }
 0xe0e   :  { %3600 = vmatpush3.xpose.msk.msra.mxu0 %vm226_vm1, %v1761_v19  ;;  %v1759_v20 = vpop.permute.xlu0 %1758 }
 0xe0f   :  { %3601 = vmatprep.subr.msk.mxu0 %vm226_vm1, %v1759_v20 }
 0xe12   :  { %3602 = vmatpush3.xpose.msk.msra.mxu0 %vm226_vm1, %v1759_v20 }
 0xe15   :  { %3604 = vmatmul.mubr.msk.f32.vlgmr.msra.gmra.mxu0 %vm226_vm1, %v4301_v14 }
 0xed5   :  { %v3605_v16 = vpop.f32.mrf.mxu0 }
 0xed6   :  { %v1846_v21 = vmul.f32 0.35355338, %v3605_v16 }
 0xed7   :  { %v1836_v22 = vpop.f32.mrf.mxu0 }
 0xed8   :  { %v1845_v23 = vmul.f32 0.35355338, %v1836_v22  ;;  %v1848_v24 = vsel %vm122_vm2, %v1846_v21, -1000000.0 }
 0xed9   :  { %v1852_v27 = vsel %vm314_vm3, %v1848_v24, -inf }
 0xeda   :  { %1853 = vmax.xlane.f32.xlu0 %v1852_v27  ;;  %v1847_v28 = vsel %vm121_vm4, %v1845_v23, -1000000.0 }
 0xedb   :  { %v1849_v29 = vsel %vm314_vm3, %v1847_v28, -inf }
 0xedc   :  { %1850 = vmax.xlane.f32.xlu1 %v1849_v29 }
 0xeed   :  { %1873 = vrot.lane.b32.xlu1 %v4301_v14, %s3920_s24 }
 0xef1   :  { %1964 = vrot.lane.b32.xlu1 %v4301_v14, %s3917_s1 }
 0xef5   :  { %1962 = vrot.lane.b32.xlu1 %v4303_v17, %s3917_s1 }
 0xf63   :  { %v1854_v30 = vpop.xlane.xlu0 %1853 }
 0xf64   :  { %v1856_v31 = vsub.f32 %v1848_v24, %v1854_v30 }
 0xf65   :  { %v1851_v32 = vpop.xlane.xlu1 %1850 }
 0xf66   :  { %v1859_v33 = vmul.f32 1.442695, %v1856_v31  ;;  %v1855_v34 = vsub.f32 %v1847_v28, %v1851_v32 }
 0xf68   :  { %3763 = vpow2.f32 %v1859_v33  ;;  %v1857_v35 = vmul.f32 1.442695, %v1855_v34 }
 0xf69   :  { %v1874_v36 = vpop.permute.xlu1 %1873 }
 0xf6a   :  { %3765 = vpow2.f32 %v1857_v35  ;;  %3606 = vmatprep.subr.mxu1 %v1874_v36 }
 0xf6b   :  { %3607 = vmatpush3.msra.mxu1 %v1874_v36 }
 0xf6d   :  { %v1965_v42 = vpop.permute.xlu1 %1964 }
 0xf71   :  { %v1963_v43 = vpop.permute.xlu1 %1962 }
 0xf75   :  { %v3764_v18 = vpop.eup %3763 }
 0xf76   :  { %v1864_v37 = vsel %vm314_vm3, %v3764_v18, 0.0 }
 0xf77   :  { %v3766_v39 = vpop.eup %3765  ;;  %1865 = vadd.xlane.f32.xlu0 %v1864_v37 }
 0xf78   :  { %v1861_v41 = vsel %vm314_vm3, %v3766_v39, 0.0 }
 0xf79   :  { %1862 = vadd.xlane.f32.xlu1 %v1861_v41 }
 0xf8a   :  { %1960 = vrot.lane.b32.xlu1 %v4301_v14, %s3919_s25 }
 0xf8d   :  { %1871 = vrot.lane.b32.xlu0 %v4303_v17, %s3920_s24  ;;  %s4543_s24 = smov 40  }
 0xf91   :  { %1958 = vrot.lane.b32.xlu0 %v4303_v17, %s3919_s25 }
0x1000   :  { %v1866_v44 = vpop.xlane.xlu0 %1865 }
0x1001   :  { %3767 = vrcp.f32 %v1866_v44 }
0x1002   :  { %v1863_v45 = vpop.xlane.xlu1 %1862 }
0x1003   :  { %3769 = vrcp.f32 %v1863_v45 }
0x1004   :  { %v1872_v46 = vpop.permute.xlu0 %1871 }
0x1005   :  { %3608 = vmatprep.subr.mxu1 %v1872_v46 }
0x1006   :  { %3609 = vmatpush3.msra.mxu1 %v1872_v46  ;;  %v1961_v38 = vpop.permute.xlu1 %1960 }
0x1007   :  { %3613 = vmatprep.subr.msk.mxu1 %vm226_vm1, %v1965_v42 }
0x1008   :  { %v1959_v51 = vpop.permute.xlu0 %1958 }
0x100e   :  { %v3768_v47 = vpop.eup %3767 }
0x100f   :  { %v1870_v50 = vmul.f32 %v3768_v47, %v3764_v18 }
0x1010   :  { %v3770_v48 = vpop.eup %3769 }
0x1011   :  { %v1869_v49 = vmul.f32 %v3770_v48, %v3766_v39 }
0x1013   :  { %3610 = vmatprep.mubr.msk.f32.mxu1 %vm314_vm3, %v1869_v49 }
0x1014   :  { %3611 = vmatmul.mubr.msk.f32.vlgmr.msra.gmra.mxu1 %vm314_vm3, %v1870_v50 }
0x1015   :  { %3614 = vmatpush3.xpose.msk.msra.mxu1 %vm226_vm1, %v1965_v42  ;;  %3617 = vmatprep.mubr.msk.f32.mxu1 %vm226_vm1, %v1959_v51 }
0x1016   :  { %3615 = vmatprep.subr.msk.mxu1 %vm226_vm1, %v1963_v43 }
0x1019   :  { %3616 = vmatpush3.xpose.msk.msra.mxu1 %vm226_vm1, %v1963_v43 }
0x101a   :  { %3632 = vmatprep.subr.mxu1 %v3273_v40 }
0x101c   :  { %3618 = vmatmul.mubr.msk.f32.vlgmr.msra.gmra.mxu1 %vm226_vm1, %v1961_v38 }
0x101d   :  { %3633 = vmatpush3.msra.mxu1 %v3273_v40 }
0x10d4   :  { %v3612_v52 = vpop.f32.mrf.mxu1 }
0x10d6   :  { %v1949_v53 = vpop.f32.mrf.mxu1 }
0x10d7   :  { %3634 = vmatprep.mubr.msk.f32.mxu1 %vm226_vm1, %v1949_v53 }
0x10d8   :  { %3635 = vmatmul.mubr.msk.f32.vlgmr.msra.gmra.mxu1 %vm226_vm1, %v3612_v52 }
0x10dc   :  { %v3619_v54 = vpop.f32.mrf.mxu1 }
0x10dd   :  { %v2050_v55 = vmul.f32 0.35355338, %v3619_v54 }
0x10de   :  { %v2040_v56 = vpop.f32.mrf.mxu1 }
0x10df   :  { %v2049_v57 = vmul.f32 0.35355338, %v2040_v56  ;;  %v2052_v58 = vsel %vm122_vm2, %v2050_v55, -1000000.0 }
0x10e0   :  { %v2056_v59 = vsel %vm314_vm3, %v2052_v58, -inf }
0x10e1   :  { %2057 = vmax.xlane.f32.xlu1 %v2056_v59  ;;  %v2051_v60 = vsel %vm121_vm4, %v2049_v57, -1000000.0 }
0x10e2   :  { %v2053_v61 = vsel %vm314_vm3, %v2051_v60, -inf }
0x10e3   :  { %2054 = vmax.xlane.f32.xlu0 %v2053_v61 }
0x10f2   :  { %2077 = vrot.lane.b32.xlu1 %v4301_v14, %s3921_s28 }
0x10f6   :  { %2330 = vrot.lane.b32.xlu1 %v4301_v14, %s3922_s29 }
0x10fa   :  { %2328 = vrot.lane.b32.xlu1 %v4303_v17, %s3922_s29 }
0x10fe   :  { %2326 = vrot.lane.b32.xlu1 %v4301_v14, %s3923_s2 }
0x1102   :  { %2615 = vrot.lane.b32.xlu1 %v4303_v17, %s3924_s30 }
0x1106   :  { %2613 = vrot.lane.b32.xlu1 %v4301_v14, %s3925_s0 }
0x116a   :  { %v2058_v62 = vpop.xlane.xlu1 %2057 }
0x116b   :  { %v2060_v13 = vsub.f32 %v2052_v58, %v2058_v62 }
0x116c   :  { %v2055_v12 = vpop.xlane.xlu0 %2054 }
0x116d   :  { %v2063_v63 = vmul.f32 1.442695, %v2060_v13  ;;  %v2059_v0 = vsub.f32 %v2051_v60, %v2055_v12 }
0x116e   :  { %v2078_v1 = vpop.permute.xlu1 %2077 }
0x116f   :  { %3771 = vpow2.f32 %v2063_v63  ;;  %v2061_v2 = vmul.f32 1.442695, %v2059_v0  ;;  %3620 = vmatprep.subr.mxu0 %v2078_v1 }
0x1170   :  { %3621 = vmatpush3.msra.mxu0 %v2078_v1 }
0x1171   :  { %3773 = vpow2.f32 %v2061_v2 }
0x1172   :  { %v2331_v22 = vpop.permute.xlu1 %2330 }
0x1176   :  { %v2329_v27 = vpop.permute.xlu1 %2328 }
0x117a   :  { %v2327_v30 = vpop.permute.xlu1 %2326 }
0x117c   :  { %v3772_v3 = vpop.eup %3771 }
0x117d   :  { %v2068_v4 = vsel %vm314_vm3, %v3772_v3, 0.0 }
0x117e   :  { %v3774_v5 = vpop.eup %3773  ;;  %2069 = vadd.xlane.f32.xlu0 %v2068_v4  ;;  %v2616_v32 = vpop.permute.xlu1 %2615 }
0x117f   :  { %v2065_v6 = vsel %vm314_vm3, %v3774_v5, 0.0 }
0x1182   :  { %2066 = vadd.xlane.f32.xlu0 %v2065_v6  ;;  %v2614_v33 = vpop.permute.xlu1 %2613 }
0x1198   :  { %2075 = vrot.lane.b32.xlu0 %v4303_v17, %s3921_s28 }
0x119c   :  { %2324 = vrot.lane.b32.xlu0 %v4303_v17, %s3923_s2 }
0x11a0   :  { %2617 = vrot.lane.b32.xlu0 %v4301_v14, %s3924_s30 }
0x11a4   :  { %2611 = vrot.lane.b32.xlu0 %v4303_v17, %s3925_s0 }
0x1207   :  { %v2070_v7 = vpop.xlane.xlu0 %2069 }
0x1208   :  { %3775 = vrcp.f32 %v2070_v7 }
0x120b   :  { %v2067_v10 = vpop.xlane.xlu0 %2066 }
0x120c   :  { %3777 = vrcp.f32 %v2067_v10 }
0x120f   :  { %v2076_v11 = vpop.permute.xlu0 %2075 }
0x1210   :  { %3622 = vmatprep.subr.mxu0 %v2076_v11 }
0x1211   :  { %3623 = vmatpush3.msra.mxu0 %v2076_v11 }
0x1212   :  { %3627 = vmatprep.subr.mxu0 %v3274_v15 }
0x1213   :  { %v2325_v23 = vpop.permute.xlu0 %2324 }
0x1215   :  { %v3776_v19 = vpop.eup %3775 }
0x1216   :  { %v2074_v21 = vmul.f32 %v3776_v19, %v3772_v3  ;;  %v3275_v3 = vld [vmem:[%s4526_s6 + $0x30] sm:$0xff] }
0x1217   :  { %v2618_v29 = vpop.permute.xlu0 %2617 }
0x1219   :  { %v3778_v20 = vpop.eup %3777 }
0x121a   :  { %v2073_v16 = vmul.f32 %v3778_v20, %v3774_v5 }
0x121b   :  { %v2612_v31 = vpop.permute.xlu0 %2611 }
0x121c   :  { %3624 = vmatprep.mubr.msk.f32.mxu0 %vm314_vm3, %v2073_v16  ;;  %v3636_v16 = vpop.f32.mrf.mxu1 }
0x121d   :  { %3625 = vmatmul.mubr.msk.f32.vlgmr.msra.gmra.mxu0 %vm314_vm3, %v2074_v21 }
0x121e   :  { %3628 = vmatpush3.msra.mxu0 %v3274_v15  ;;  %v2315_v21 = vpop.f32.mrf.mxu1 }
0x121f   :  { %3637 = vmatprep.subr.msk.mxu0 %vm226_vm1, %v2331_v22 }
0x12dd   :  { %v3626_v24 = vpop.f32.mrf.mxu0 }
0x12df   :  { %v2153_v28 = vpop.f32.mrf.mxu0 }
0x12e0   :  { %3629 = vmatprep.mubr.msk.f32.mxu0 %vm226_vm1, %v2153_v28 }
0x12e1   :  { %3630 = vmatmul.mubr.msk.f32.vlgmr.msra.gmra.mxu0 %vm226_vm1, %v3626_v24 }
0x12e2   :  { %3638 = vmatpush3.xpose.msk.msra.mxu0 %vm226_vm1, %v2331_v22  ;;  %3641 = vmatprep.mubr.msk.f32.mxu0 %vm226_vm1, %v2325_v23 }
0x12e3   :  { %3639 = vmatprep.subr.msk.mxu0 %vm226_vm1, %v2329_v27 }
0x12e6   :  { %3640 = vmatpush3.xpose.msk.msra.mxu0 %vm226_vm1, %v2329_v27 }
0x12e7   :  { %3656 = vmatprep.subr.msk.mxu0 %vm226_vm1, %v2618_v29 }
0x12e9   :  { %3642 = vmatmul.mubr.msk.f32.vlgmr.msra.gmra.mxu0 %vm226_vm1, %v2327_v30 }
0x12ea   :  { %3657 = vmatpush3.xpose.msk.msra.mxu0 %vm226_vm1, %v2618_v29  ;;  %3660 = vmatprep.mubr.msk.f32.mxu0 %vm226_vm1, %v2612_v31  ;;  %v3276_v31 = vld [vmem:[%s4526_s6 + $0x38] sm:$0xff] }
0x12eb   :  { %3658 = vmatprep.subr.msk.mxu0 %vm226_vm1, %v2616_v32 }
0x12ee   :  { %3659 = vmatpush3.xpose.msk.msra.mxu0 %vm226_vm1, %v2616_v32 }
0x12f1   :  { %3661 = vmatmul.mubr.msk.f32.vlgmr.msra.gmra.mxu0 %vm226_vm1, %v2614_v33 }
0x13a1   :  { %v4397_v34 = vpop.f32.mrf.mxu0 }
0x13a2   :  { %v2321_v32 = vadd.f32 %v3636_v16, %v4397_v34  ;;  %v3326_v16 = vld [vmem:[%s4532_s12 + $0x58] sm:$0xff] }
0x13a3   :  { %v4399_v35 = vpop.f32.mrf.mxu0 }
0x13a9   :  { %v3643_v36 = vpop.f32.mrf.mxu0 }
0x13aa   :  { %v2416_v18 = vmul.f32 0.35355338, %v3643_v36  ;;  %v2316_v36 = vadd.f32 %v2315_v21, %v4399_v35  ;;  %v3325_v21 = vld [vmem:[%s4532_s12 + $0x50] sm:$0xff] }
0x13ab   :  { %v2406_v37 = vpop.f32.mrf.mxu0 }
0x13ac   :  { %v2415_v39 = vmul.f32 0.35355338, %v2406_v37  ;;  %v2418_v41 = vsel %vm122_vm2, %v2416_v18, -1000000.0 }
0x13ad   :  { %v2422_v42 = vsel %vm314_vm3, %v2418_v41, -inf }
0x13ae   :  { %2423 = vmax.xlane.f32.xlu1 %v2422_v42  ;;  %v2417_v43 = vsel %vm121_vm4, %v2415_v39, -1000000.0 }
0x13af   :  { %v2419_v44 = vsel %vm314_vm3, %v2417_v43, -inf }
0x13b0   :  { %2420 = vmax.xlane.f32.xlu0 %v2419_v44  ;;  %v3310_v44 = vld [vmem:[%s4527_s7 + $0x1] ss:$0 sm:$0xff] }
0x13b1   :  { %v3662_v45 = vpop.f32.mrf.mxu0 }
0x13b2   :  { %v2703_v61 = vmul.f32 0.35355338, %v3662_v45 }
0x13b3   :  { %v2693_v46 = vpop.f32.mrf.mxu0 }
0x13b4   :  { %v2702_v47 = vmul.f32 0.35355338, %v2693_v46  ;;  %v2705_v12 = vsel %vm122_vm2, %v2703_v61, -1000000.0  ;;  %v3330_v61 = vld [vmem:[%s4532_s12 + $0x78] sm:$0xff] }
0x13b5   :  { %v2709_v63 = vsel %vm314_vm3, %v2705_v12, -inf }
0x13b6   :  { %v2704_v48 = vsel %vm121_vm4, %v2702_v47, -1000000.0 }
0x13b7   :  { %v2706_v49 = vsel %vm314_vm3, %v2704_v48, -inf }
0x13bf   :  { %2443 = vrot.lane.b32.xlu1 %v4301_v14, %s3926_s20 }
0x13e3   :  { %2707 = vmax.xlane.f32.xlu1 %v2706_v49 }
0x1437   :  { %v2424_v50 = vpop.xlane.xlu1 %2423 }
0x1438   :  { %v2426_v51 = vsub.f32 %v2418_v41, %v2424_v50 }
0x1439   :  { %v2421_v38 = vpop.xlane.xlu0 %2420 }
0x143a   :  { %v2429_v40 = vmul.f32 1.442695, %v2426_v51  ;;  %v2425_v52 = vsub.f32 %v2417_v43, %v2421_v38 }
0x143b   :  { %v2444_v53 = vpop.permute.xlu1 %2443 }
0x143c   :  { %3779 = vpow2.f32 %v2429_v40  ;;  %v2427_v54 = vmul.f32 1.442695, %v2425_v52  ;;  %3644 = vmatprep.subr.mxu1 %v2444_v53 }
0x143d   :  { %3645 = vmatpush3.msra.mxu1 %v2444_v53 }
0x143e   :  { %3781 = vpow2.f32 %v2427_v54 }
0x1449   :  { %v3780_v55 = vpop.eup %3779 }
0x144a   :  { %v2434_v56 = vsel %vm314_vm3, %v3780_v55, 0.0 }
0x144b   :  { %v3782_v57 = vpop.eup %3781  ;;  %2435 = vadd.xlane.f32.xlu0 %v2434_v56 }
0x144c   :  { %v2431_v26 = vsel %vm314_vm3, %v3782_v57, 0.0 }
0x144f   :  { %2432 = vadd.xlane.f32.xlu0 %v2431_v26 }
0x1465   :  { %2441 = vrot.lane.b32.xlu0 %v4303_v17, %s3926_s20 }
0x146c   :  { %v2708_v58 = vpop.xlane.xlu1 %2707 }
0x146d   :  { %v2712_v59 = vsub.f32 %v2704_v48, %v2708_v58  ;;  %v3317_v58 = vld [vmem:[%s4530_s10 + $0x30] sm:$0xff] }
0x146f   :  { %v2714_v60 = vmul.f32 1.442695, %v2712_v59  ;;  %v3316_v59 = vld [vmem:[%s4530_s10 + $0x28] sm:$0xff] }
0x1471   :  { %3783 = vpow2.f32 %v2714_v60  ;;  %v3315_v60 = vld [vmem:[%s4530_s10 + $0x20] sm:$0xff] }
0x147e   :  { %v3784_v62 = vpop.eup %3783 }
0x147f   :  { %v2718_v13 = vsel %vm314_vm3, %v3784_v62, 0.0 }
0x1480   :  { %2719 = vadd.xlane.f32.xlu1 %v2718_v13  ;;  %v3328_v13 = vld [vmem:[%s4532_s12 + $0x68] sm:$0xff] }
0x1484   :  { %2710 = vmax.xlane.f32.xlu0 %v2709_v63 }
0x1491   :  { %2730 = vrot.lane.b32.xlu1 %v4301_v14, %s4543_s24 }
0x14d4   :  { %v2436_v0 = vpop.xlane.xlu0 %2435 }
0x14d5   :  { %3785 = vrcp.f32 %v2436_v0 }
0x14d8   :  { %v2433_v1 = vpop.xlane.xlu0 %2432 }
0x14d9   :  { %3787 = vrcp.f32 %v2433_v1 }
0x14dc   :  { %v2442_v2 = vpop.permute.xlu0 %2441 }
0x14dd   :  { %3646 = vmatprep.subr.mxu1 %v2442_v2 }
0x14de   :  { %3647 = vmatpush3.msra.mxu1 %v2442_v2 }
0x14df   :  { %3651 = vmatprep.subr.mxu1 %v3275_v3 }
0x14e2   :  { %v3786_v25 = vpop.eup %3785 }
0x14e3   :  { %v2440_v6 = vmul.f32 %v3786_v25, %v3780_v55 }
0x14e6   :  { %v3788_v4 = vpop.eup %3787 }
0x14e7   :  { %v2439_v5 = vmul.f32 %v3788_v4, %v3782_v57 }
0x14e9   :  { %3648 = vmatprep.mubr.msk.f32.mxu1 %vm314_vm3, %v2439_v5  ;;  %v3313_v5 = vld [vmem:[%s4528_s8 + $0x1] ss:$0 sm:$0xff] }
0x14ea   :  { %3649 = vmatmul.mubr.msk.f32.vlgmr.msra.gmra.mxu1 %vm314_vm3, %v2440_v6 }
0x14eb   :  { %3652 = vmatpush3.msra.mxu1 %v3275_v3 }
0x1509   :  { %v2720_v14 = vpop.xlane.xlu1 %2719 }
0x150d   :  { %v2731_v7 = vpop.permute.xlu1 %2730  ;;  %v2711_v10 = vpop.xlane.xlu0 %2710 }
0x150e   :  { %v2713_v11 = vsub.f32 %v2705_v12, %v2711_v10  ;;  %3663 = vmatprep.subr.mxu1 %v2731_v7  ;;  %v3327_v12 = vld [vmem:[%s4532_s12 + $0x60] sm:$0xff] }
0x1510   :  { %v2716_v15 = vmul.f32 1.442695, %v2713_v11  ;;  %v3314_v11 = vld [vmem:[%s4529_s9 + $0x1] ss:$0 sm:$0xff] }
0x1512   :  { %3789 = vpow2.f32 %v2716_v15 }
0x1513   :  { %3791 = vrcp.f32 %v2720_v14 }
0x151f   :  { %v3790_v19 = vpop.eup %3789 }
0x1520   :  { %v2721_v20 = vsel %vm314_vm3, %v3790_v19, 0.0  ;;  %v3792_v22 = vpop.eup %3791 }
0x1521   :  { %2722 = vadd.xlane.f32.xlu0 %v2721_v20  ;;  %v2726_v28 = vmul.f32 %v3792_v22, %v3784_v62  ;;  %v3329_v62 = vld [vmem:[%s4532_s12 + $0x70] sm:$0xff]  ;;  %v3324_v22 = vld [vmem:[%s4532_s12 + $0x48] sm:$0xff] }
0x1537   :  { %2728 = vrot.lane.b32.xlu0 %v4303_v17, %s4543_s24 }
0x15aa   :  { %v3650_v23 = vpop.f32.mrf.mxu1  ;;  %v2723_v24 = vpop.xlane.xlu0 %2722 }
0x15ab   :  { %3793 = vrcp.f32 %v2723_v24  ;;  %v3320_v24 = vld [vmem:[%s4531_s11 + $0x1] ss:$0 sm:$0xff] }
0x15ac   :  { %v2519_v27 = vpop.f32.mrf.mxu1 }
0x15ad   :  { %3653 = vmatprep.mubr.msk.f32.mxu1 %vm226_vm1, %v2519_v27 }
0x15ae   :  { %3654 = vmatmul.mubr.msk.f32.vlgmr.msra.gmra.mxu1 %vm226_vm1, %v3650_v23  ;;  %v2729_v29 = vpop.permute.xlu0 %2728  ;;  %v3323_v23 = vld [vmem:[%s4532_s12 + $0x40] sm:$0xff] }
0x15af   :  { %3664 = vmatpush3.msra.mxu1 %v2731_v7  ;;  %3667 = vmatprep.mubr.msk.f32.mxu1 %vm314_vm3, %v2726_v28 }
0x15b0   :  { %3665 = vmatprep.subr.mxu1 %v2729_v29 }
0x15b1   :  { %3666 = vmatpush3.msra.mxu1 %v2729_v29 }
0x15b2   :  { %3670 = vmatprep.subr.mxu1 %v3276_v31 }
0x15b8   :  { %v3794_v17 = vpop.eup %3793 }
0x15b9   :  { %v2727_v30 = vmul.f32 %v3794_v17, %v3790_v19 }
0x15bb   :  { %3668 = vmatmul.mubr.msk.f32.vlgmr.msra.gmra.mxu1 %vm314_vm3, %v2727_v30 }
0x15bc   :  { %3671 = vmatpush3.msra.mxu1 %v3276_v31 }
0x15bd   :  { %3686 = vmatprep.subr.mxu1 %v3330_v61 }
0x166e   :  { %v3655_v33 = vpop.f32.mrf.mxu1 }
0x166f   :  { %v2610_v18 = vadd.f32 %v3655_v33, %v2321_v32  ;;  %v3332_v32 = vld [vmem:[%s4533_s13 + $0x1] ss:$0 sm:$0xff] }
0x1670   :  { %v2600_v37 = vpop.f32.mrf.mxu1 }
0x1671   :  { %v2609_v39 = vadd.f32 %v2600_v37, %v2316_v36 }
0x167b   :  { %v3669_v41 = vpop.f32.mrf.mxu1 }
0x167d   :  { %v2806_v42 = vpop.f32.mrf.mxu1 }
0x167e   :  { %3672 = vmatprep.mubr.msk.f32.mxu1 %vm226_vm1, %v2806_v42 }
0x167f   :  { %3673 = vmatmul.mubr.msk.f32.vlgmr.msra.gmra.mxu1 %vm226_vm1, %v3669_v41 }
0x1680   :  { %3687 = vmatpush3.msra.mxu1 %v3330_v61 }
0x1681   :  { %3688 = vmatprep.subr.mxu1 %v3329_v62 }
0x1682   :  { %3689 = vmatpush3.msra.mxu1 %v3329_v62 }
0x1683   :  { %3690 = vmatprep.subr.mxu1 %v3328_v13 }
0x1684   :  { %3691 = vmatpush3.msra.mxu1 %v3328_v13 }
0x1685   :  { %3692 = vmatprep.subr.mxu1 %v3327_v12 }
0x1686   :  { %3693 = vmatpush3.msra.mxu1 %v3327_v12 }
0x1687   :  { %3694 = vmatprep.subr.mxu1 %v3326_v16 }
0x1688   :  { %3695 = vmatpush3.msra.mxu1 %v3326_v16 }
0x1689   :  { %3696 = vmatprep.subr.mxu1 %v3325_v21 }
0x168a   :  { %3697 = vmatpush3.msra.mxu1 %v3325_v21 }
0x168b   :  { %3698 = vmatprep.subr.mxu1 %v3324_v22 }
0x168c   :  { %3699 = vmatpush3.msra.mxu1 %v3324_v22 }
0x168d   :  { %3700 = vmatprep.subr.mxu1 %v3323_v23 }
0x168e   :  { %3701 = vmatpush3.msra.mxu1 %v3323_v23 }
0x173f   :  { %v3674_v43 = vpop.f32.mrf.mxu1 }
0x1740   :  { %v2897_v45 = vadd.f32 %v3674_v43, %v2610_v18 }
0x1741   :  { %v2887_v46 = vpop.f32.mrf.mxu1 }
0x1742   :  { %v2907_v34 = vadd.f32 %v3310_v44, %v2897_v45  ;;  %v2896_v47 = vadd.f32 %v2887_v46, %v2609_v39 }
0x1744   :  { %v2906_v48 = vadd.f32 %v3310_v44, %v2896_v47  ;;  %v2909_v35 = vadd.f32 %v2907_v34, %v4292_v9 }
0x1746   :  { %v2917_v49 = vsel %vm134_vm0, %v2909_v35, 0.0  ;;  %v2908_v50 = vadd.f32 %v2906_v48, %v4290_v8  ;;  %v3318_v8 = vld [vmem:[%s4530_s10 + $0x38] sm:$0xff] }
0x1747   :  { %2918 = vadd.xlane.f32.xlu0 %v2917_v49  ;;  %3675 = vmatprep.subr.mxu0 %v3318_v8 }
0x1748   :  { %v2914_v51 = vsel %vm134_vm0, %v2908_v50, 0.0  ;;  %3676 = vmatpush3.msra.mxu0 %v3318_v8  ;;  %v3338_v8 = vld [vmem:[%s4535_s15 + $0x1] ss:$0 sm:$0xff] }
0x1749   :  { %2915 = vadd.xlane.f32.xlu1 %v2914_v51  ;;  %3677 = vmatprep.subr.mxu0 %v3317_v58 }
0x174a   :  { %3678 = vmatpush3.msra.mxu0 %v3317_v58 }
0x174b   :  { %3679 = vmatprep.subr.mxu0 %v3316_v59 }
0x174c   :  { %3680 = vmatpush3.msra.mxu0 %v3316_v59 }
0x174d   :  { %3681 = vmatprep.subr.mxu0 %v3315_v60 }
0x174e   :  { %3682 = vmatpush3.msra.mxu0 %v3315_v60 }
0x17d0   :  { %v2919_v38 = vpop.xlane.xlu0 %2918 }
0x17d1   :  { %v2921_v40 = vmul.f32 0.03125, %v2919_v38 }
0x17d2   :  { %v2916_v52 = vpop.xlane.xlu1 %2915 }
0x17d3   :  { %v2923_v53 = vsub.f32 %v2909_v35, %v2921_v40  ;;  %v2920_v54 = vmul.f32 0.03125, %v2916_v52 }
0x17d5   :  { %v2922_v55 = vsub.f32 %v2908_v50, %v2920_v54  ;;  %v2925_v56 = vmul.f32 %v2923_v53, %v2923_v53 }
0x17d7   :  { %v2929_v57 = vsel %vm134_vm0, %v2925_v56, 0.0  ;;  %v2924_v26 = vmul.f32 %v2922_v55, %v2922_v55 }
0x17d8   :  { %2930 = vadd.xlane.f32.xlu0 %v2929_v57  ;;  %v3337_v57 = vld [vmem:[%s4534_s14 + $0x1] ss:$0 sm:$0xff] }
0x17d9   :  { %v2926_v9 = vsel %vm134_vm0, %v2924_v26, 0.0 }
0x17da   :  { %2927 = vadd.xlane.f32.xlu1 %v2926_v9 }
0x1861   :  { %v2931_v63 = vpop.xlane.xlu0 %2930 }
0x1862   :  { %v2933_v0 = vmul.f32 0.03125, %v2931_v63 }
0x1863   :  { %v2928_v1 = vpop.xlane.xlu1 %2927 }
0x1864   :  { %v2935_v2 = vadd.f32 1e-05, %v2933_v0  ;;  %v2932_v3 = vmul.f32 0.03125, %v2928_v1 }
0x1866   :  { %3795 = vrsqrt.f32 %v2935_v2  ;;  %v2934_v25 = vadd.f32 1e-05, %v2932_v3 }
0x1868   :  { %3797 = vrsqrt.f32 %v2934_v25 }
0x1873   :  { %v3796_v4 = vpop.eup %3795 }
0x1874   :  { %v2939_v6 = vmul.f32 %v3796_v4, %v2923_v53 }
0x1875   :  { %v3798_v14 = vpop.eup %3797 }
0x1876   :  { %v2938_v7 = vmul.f32 %v3798_v14, %v2922_v55  ;;  %v2947_v10 = vmul.f32 %v3313_v5, %v2939_v6 }
0x1878   :  { %v2946_v15 = vmul.f32 %v3313_v5, %v2938_v7  ;;  %v2955_v20 = vadd.f32 %v3314_v11, %v2947_v10 }
0x187a   :  { %v2954_v19 = vadd.f32 %v3314_v11, %v2946_v15 }
0x187c   :  { %3683 = vmatprep.mubr.msk.f32.mxu0 %vm134_vm0, %v2954_v19 }
0x187d   :  { %3684 = vmatmul.mubr.msk.f32.vlgmr.msra.gmra.mxu0 %vm134_vm0, %v2955_v20 }
0x193d   :  { %v3685_v27 = vpop.f32.mrf.mxu0 }
0x193e   :  { %v3047_v28 = vadd.f32 %v3685_v27, %v3320_v24 }
0x193f   :  { %v3041_v29 = vpop.f32.mrf.mxu0 }
0x1940   :  { %v3042_v17 = vadd.f32 %v3320_v24, %v3041_v29  ;;  %v3051_v31 = vmax.f32 %v3047_v28, 0.0 }
0x1942   :  { %v3050_v30 = vmax.f32 %v3042_v17, 0.0 }
0x1944   :  { %3702 = vmatprep.mubr.msk.f32.mxu1 %vm1529_vm5, %v3050_v30 }
0x1945   :  { %3703 = vmatmul.mubr.msk.f32.vlgmr.msra.gmra.mxu1 %vm1529_vm5, %v3051_v31 }
0x1a05   :  { %v3704_v33 = vpop.f32.mrf.mxu1 }
0x1a06   :  { %v3147_v36 = vadd.f32 %v3704_v33, %v3332_v32 }
0x1a07   :  { %v3141_v18 = vpop.f32.mrf.mxu1 }
0x1a08   :  { %v3142_v37 = vadd.f32 %v3332_v32, %v3141_v18  ;;  %v3151_v39 = vadd.f32 %v3147_v36, %v2955_v20 }
0x1a0a   :  { %v3159_v41 = vsel %vm134_vm0, %v3151_v39, 0.0  ;;  %v3150_v42 = vadd.f32 %v3142_v37, %v2954_v19 }
0x1a0b   :  { %3160 = vadd.xlane.f32.xlu0 %v3159_v41 }
0x1a0c   :  { %v3156_v43 = vsel %vm134_vm0, %v3150_v42, 0.0 }
0x1a0d   :  { %3157 = vadd.xlane.f32.xlu1 %v3156_v43 }
0x1a94   :  { %v3161_v44 = vpop.xlane.xlu0 %3160 }
0x1a95   :  { %v3163_v45 = vmul.f32 0.03125, %v3161_v44 }
0x1a96   :  { %v3158_v46 = vpop.xlane.xlu1 %3157 }
0x1a97   :  { %v3165_v34 = vsub.f32 %v3151_v39, %v3163_v45  ;;  %v3162_v47 = vmul.f32 0.03125, %v3158_v46 }
0x1a99   :  { %v3164_v48 = vsub.f32 %v3150_v42, %v3162_v47  ;;  %v3167_v35 = vmul.f32 %v3165_v34, %v3165_v34 }
0x1a9b   :  { %v3171_v49 = vsel %vm134_vm0, %v3167_v35, 0.0  ;;  %v3166_v50 = vmul.f32 %v3164_v48, %v3164_v48 }
0x1a9c   :  { %3172 = vadd.xlane.f32.xlu0 %v3171_v49 }
0x1a9d   :  { %v3168_v51 = vsel %vm134_vm0, %v3166_v50, 0.0 }
0x1a9e   :  { %3169 = vadd.xlane.f32.xlu1 %v3168_v51 }
0x1b25   :  { %v3173_v38 = vpop.xlane.xlu0 %3172 }
0x1b26   :  { %v3175_v40 = vmul.f32 0.03125, %v3173_v38 }
0x1b27   :  { %v3170_v52 = vpop.xlane.xlu1 %3169 }
0x1b28   :  { %v3177_v53 = vadd.f32 1e-05, %v3175_v40  ;;  %v3174_v54 = vmul.f32 0.03125, %v3170_v52 }
0x1b2a   :  { %3799 = vrsqrt.f32 %v3177_v53  ;;  %v3176_v55 = vadd.f32 1e-05, %v3174_v54 }
0x1b2c   :  { %3801 = vrsqrt.f32 %v3176_v55 }
0x1b37   :  { %v3800_v56 = vpop.eup %3799 }
0x1b38   :  { %v3181_v26 = vmul.f32 %v3800_v56, %v3165_v34 }
0x1b39   :  { %v3802_v9 = vpop.eup %3801 }
0x1b3a   :  { %v3180_v58 = vmul.f32 %v3802_v9, %v3164_v48  ;;  %v3189_v59 = vmul.f32 %v3337_v57, %v3181_v26 }
0x1b3c   :  { %v3188_v60 = vmul.f32 %v3337_v57, %v3180_v58  ;;  %v3197_v61 = vadd.f32 %v3338_v8, %v3189_v59 }
0x1b3e   :  { %v3196_v62 = vadd.f32 %v3338_v8, %v3188_v60  ;;  %3199 = vst.msk [vmem:[#allocation10 + $0x8] sm:$0xff] %vm134_vm0, %v3197_v61 }
0x1b40   :  { %3198 = vst.msk [vmem:[#allocation10] sm:$0xff] %vm134_vm0, %v3196_v62 }
0x1b41   :  { %3894 = shalt.err (!%p3891_p10)
}
0x1b42   :  { %s4544_s14 = smov 8   ;;  %s4545_s15 = smov 128  }
0x1b43   :  { %3211 = dma.vmem_to_hbm [thread:$0]  %s3206_s3, 256, %s4536_s16, [#allocation4], %s4545_s15, %s4545_s15, %s4544_s14  }
0x1b44   :  { %3909 = dma.done.wait [#allocation4], 256  }
0x1b45   :  { %3910 = vsyncadd [#allocation4], 4294967040 }
0x1b46   :  { %3215 = vsyncpa [#allocation3], 1 }
0x1b47   :  { %3216 = vsyncpa [#allocation6], 1 }
0x1b48   :  { %3217 = vsyncpa [#allocation9], 1 }
0x1b49   :  { %3218 = vsyncpa [#allocation4], 1 }

</bundles_post_ra>
